<compile_context>
chip_gen: v6e
topology: v6e:2x2x1
jax: 0.10.0
libtpu: 0.0.40
codegen_flags: <defaults>
</compile_context>

<pallas_src>
import functools

import jax
import jax.numpy as jnp
from jax.experimental import pallas as pl
from jax.experimental.pallas import tpu as pltpu

EPS = 1e-5                      # BatchNorm2d default eps
LANE = 128                      # TPU lane width
TILE_R = 256                    # rows per grid step (multiple of 16 for bf16 sublanes).
                                # 256 keeps this small demo multi-tile; use 512-1024
                                # for production-size inputs (85%+ HBM roofline).
VMEM_LIMIT_BYTES = 32 * 1024 * 1024


# ---------------------------------------------------------------------------
# Pallas kernels (row-tiled, bf16 matmul inputs, f32 accumulation)
# ---------------------------------------------------------------------------
def _mm_bias_kernel(p_ref, w_ref, b_ref, o_ref):
    # conv-as-matmul + bias (used for the skip branch and the deconv)
    y = jnp.dot(p_ref[...], w_ref[...], preferred_element_type=jnp.float32)
    o_ref[...] = y + b_ref[...]


def _stats_store(y, st_ref, *, tile_r, r_true, cp_cols):
    # mask rows that are only zero-padding of the row dimension, then emit
    # per-tile sum / sum-of-squares (broadcast over 8 sublanes -> aligned block)
    row = pl.program_id(0) * tile_r + jax.lax.broadcasted_iota(jnp.int32, (tile_r, 1), 0)
    ym = jnp.where(row < r_true, y, 0.0)
    s_row = jnp.sum(ym, axis=0, keepdims=True)          # (1, Cp)
    q_row = jnp.sum(ym * ym, axis=0, keepdims=True)     # (1, Cp)
    st_ref[:, :cp_cols] = jnp.broadcast_to(s_row, (8, cp_cols))
    st_ref[:, cp_cols:] = jnp.broadcast_to(q_row, (8, cp_cols))


def _mm_bias_relu_stats_kernel(p_ref, w_ref, b_ref, o_ref, st_ref,
                               *, tile_r, r_true, cp_cols):
    # conv + bias -> ReLU ; emit per-tile BN partial statistics
    y = jnp.dot(p_ref[...], w_ref[...], preferred_element_type=jnp.float32) + b_ref[...]
    y = jnp.maximum(y, 0.0)
    o_ref[...] = y
    _stats_store(y, st_ref, tile_r=tile_r, r_true=r_true, cp_cols=cp_cols)


def _mm_bias_skip_relu_stats_kernel(p_ref, w_ref, b_ref, s_ref, o_ref, st_ref,
                                    *, tile_r, r_true, cp_cols):
    # conv + bias + skip -> ReLU ; emit per-tile BN partial statistics
    y = (jnp.dot(p_ref[...], w_ref[...], preferred_element_type=jnp.float32)
         + b_ref[...] + s_ref[...])
    y = jnp.maximum(y, 0.0)
    o_ref[...] = y
    _stats_store(y, st_ref, tile_r=tile_r, r_true=r_true, cp_cols=cp_cols)


# ---------------------------------------------------------------------------
# pallas_call wrapper: row-tiled launch
# ---------------------------------------------------------------------------
def _round_up(x, m):
    return (x + m - 1) // m * m


def _matmul_rows(patches, w_pad, b_pad, *, skip=None, with_stats=False, tile_r=TILE_R):
    """Row-tiled fused matmul.

    patches : (R, K)   f32   -> padded to (Rp, Kp), cast to bf16 here
    w_pad   : (Kp, Cp) bf16  (zero-padded; Kp, Cp multiples of 128)
    b_pad   : (1, Cp)  f32
    skip    : optional (Rp, Cp) f32, added before ReLU
    Returns (out (Rp, Cp) f32, stats (T*8, 2*Cp) f32 or None).
    """
    R, K = patches.shape
    Kp, Cp = w_pad.shape
    Rp = _round_up(R, tile_r)
    T = Rp // tile_r
    p = jnp.pad(patches, ((0, Rp - R), (0, Kp - K))).astype(jnp.bfloat16)

    def row_spec(cols):
        return pl.BlockSpec((tile_r, cols), lambda i: (i, 0))

    def full_spec(shape):
        return pl.BlockSpec(shape, lambda i: (0, 0))

    in_specs = [row_spec(Kp), full_spec((Kp, Cp)), full_spec((1, Cp))]
    args = [p, w_pad, b_pad]
    if skip is not None:
        assert skip.shape == (Rp, Cp)
        in_specs.append(row_spec(Cp))
        args.append(skip)

    cparams = pltpu.CompilerParams(
        dimension_semantics=("parallel",),           # megacore sharding on v7x
        vmem_limit_bytes=VMEM_LIMIT_BYTES,
    )

    if not with_stats:
        out = pl.pallas_call(
            _mm_bias_kernel,
            out_shape=jax.ShapeDtypeStruct((Rp, Cp), jnp.float32),
            grid=(T,),
            in_specs=in_specs,
            out_specs=row_spec(Cp),
            compiler_params=cparams,
        )(*args)
        return out, None

    body = _mm_bias_skip_relu_stats_kernel if skip is not None else _mm_bias_relu_stats_kernel
    kern = functools.partial(body, tile_r=tile_r, r_true=R, cp_cols=Cp)
    out, stats = pl.pallas_call(
        kern,
        out_shape=(jax.ShapeDtypeStruct((Rp, Cp), jnp.float32),
                   jax.ShapeDtypeStruct((T * 8, 2 * Cp), jnp.float32)),
        grid=(T,),
        in_specs=in_specs,
        out_specs=(row_spec(Cp), pl.BlockSpec((8, 2 * Cp), lambda i: (i, 0))),
        compiler_params=cparams,
    )(*args)
    return out, stats


# ---------------------------------------------------------------------------
# JAX glue: NHWC im2col, deconv tap extraction, BatchNorm finalize
# ---------------------------------------------------------------------------
def _im2col_nhwc(x, k, pad):
    # x: (N, H, W, C) -> (N*Ho*Wo, k*k*C); column order (kh, kw, c)
    N, H, W, C = x.shape
    xp = jnp.pad(x, ((0, 0), (pad, pad), (pad, pad), (0, 0)))
    Ho = H + 2 * pad - k + 1
    Wo = W + 2 * pad - k + 1
    cols = [xp[:, kh:kh + Ho, kw:kw + Wo, :] for kh in range(k) for kw in range(k)]
    pat = jnp.stack(cols, axis=3)                   # (N, Ho, Wo, k*k, C)
    return pat.reshape(N * Ho * Wo, k * k * C), Ho, Wo


def _deconv_taps_nhwc(x):
    # Sub-pixel decomposition input: taps (dy,dx) in {0,1}^2 with zero padding
    # on the bottom/right edge.  -> (N*H*W, 4*C), column order (tap, c).
    N, H, W, C = x.shape
    xp = jnp.pad(x, ((0, 0), (0, 1), (0, 1), (0, 0)))
    taps = [xp[:, dy:dy + H, dx:dx + W, :] for dy in (0, 1) for dx in (0, 1)]
    pat = jnp.stack(taps, axis=3)                   # (N, H, W, 4, C)
    return pat.reshape(N * H * W, 4 * C)


def _bn_scale_shift(stats, r_true, c, gamma, beta):
    # Reduce per-tile partial sums -> global batch mean/var (biased, as PyTorch
    # BN training-mode normalization), then fold into per-channel scale/shift.
    cp = stats.shape[1] // 2
    tot = stats[::8].sum(axis=0)                    # one row per tile
    mean = tot[:c] / r_true
    var = jnp.maximum(tot[cp:cp + c] / r_true - mean * mean, 0.0)
    scale = gamma * jax.lax.rsqrt(var + EPS)
    shift = beta - mean * scale
    return scale, shift


# ---------------------------------------------------------------------------
# Parameter preparation (PyTorch layouts -> padded bf16 matmul matrices)
# ---------------------------------------------------------------------------
def _w2mat(w_oikk):
    # Conv2d weight (Cout, Cin, kh, kw) -> (kh*kw*Cin, Cout), matching im2col cols
    Cout = w_oikk.shape[0]
    return w_oikk.transpose(2, 3, 1, 0).reshape(-1, Cout)


def _pad_cast_weight(w_mat, kp, cp):
    K, Co = w_mat.shape
    return jnp.pad(w_mat, ((0, kp - K), (0, cp - Co))).astype(jnp.bfloat16)


def _pad_bias(b, cp):
    b = b.reshape(1, -1).astype(jnp.float32)
    return jnp.pad(b, ((0, 0), (0, cp - b.shape[-1])))


def _make_deconv_matrix(wt, C, Cout, Cop):
    # ConvTranspose2d weight wt: (Cin=C, Cout, 3, 3).  Equivalent stride-1 conv
    # weight: Wf[o, c, kh, kw] = wt[c, o, 2-kh, 2-kw].  Phase (py,px) of the
    # stride-2 output only sees kernel taps at kh = 1-py+2*py*dy, kw likewise,
    # reading undilated input tap (dy, dx).
    Wf = jnp.flip(wt, axis=(2, 3)).transpose(1, 0, 2, 3)     # (Cout, C, 3, 3)
    Wd = jnp.zeros((4 * C, 4 * Cop), jnp.float32)            # rows (tap,c), cols (phase,o)
    for py in range(2):
        for px in range(2):
            phase = py * 2 + px
            for dy in range(2):
                for dx in range(2):
                    if (dy == 1 and py == 0) or (dx == 1 and px == 0):
                        continue
                    kh = 1 - py + 2 * py * dy
                    kw = 1 - px + 2 * px * dx
                    tap = dy * 2 + dx
                    blk = Wf[:, :, kh, kw].T                 # (C, Cout)
                    Wd = Wd.at[tap * C:(tap + 1) * C,
                               phase * Cop:phase * Cop + Cout].set(blk)
    return Wd


def _make_deconv_bias(bd, Cout, Cop):
    b = jnp.zeros((1, 4 * Cop), jnp.float32)
    for phase in range(4):
        b = b.at[0, phase * Cop:phase * Cop + Cout].set(bd)
    return b


def make_params(key, C, k=3):
    Ci = C // 2
    Cp = _round_up(C, LANE)                # lane-dense out-channels (conv1/conv2/skip)
    Cop = _round_up(Ci, LANE)              # lane-dense out-channels per deconv phase
    K1p = _round_up(k * k * Ci, LANE)      # contraction dims padded to 128
    K2p = _round_up(k * k * C, LANE)
    Kdp = _round_up(4 * C, LANE)

    ks = jax.random.split(key, 8)
    s = 0.1
    w_skip = s * jax.random.normal(ks[0], (C, Ci, k, k), jnp.float32)
    b_skip = s * jax.random.normal(ks[1], (C,), jnp.float32)
    w1 = s * jax.random.normal(ks[2], (C, Ci, k, k), jnp.float32)
    b1 = s * jax.random.normal(ks[3], (C,), jnp.float32)
    w2 = s * jax.random.normal(ks[4], (C, C, k, k), jnp.float32)
    b2 = s * jax.random.normal(ks[5], (C,), jnp.float32)
    wt = s * jax.random.normal(ks[6], (C, Ci, k, k), jnp.float32)   # ConvTranspose2d layout
    bd = s * jax.random.normal(ks[7], (Ci,), jnp.float32)

    p = {
        "w_skip": _pad_cast_weight(_w2mat(w_skip), K1p, Cp),
        "b_skip": _pad_bias(b_skip, Cp),
        "w1": _pad_cast_weight(_w2mat(w1), K1p, Cp),
        "b1": _pad_bias(b1, Cp),
        "g1": jnp.ones((C,), jnp.float32),          # BatchNorm2d default affine init
        "bt1": jnp.zeros((C,), jnp.float32),
        "w2": _pad_cast_weight(_w2mat(w2), K2p, Cp),
        "b2": _pad_bias(b2, Cp),
        "g2": jnp.ones((C,), jnp.float32),
        "bt2": jnp.zeros((C,), jnp.float32),
        "w_deconv": _pad_cast_weight(_make_deconv_matrix(wt, C, Ci, Cop), Kdp, 4 * Cop),
        "b_deconv": _make_deconv_bias(bd, Ci, Cop),
    }
    return p


# ---------------------------------------------------------------------------
# Bottleneck forward (depthwise_conv='None' => groups=1, no *_m layers)
# ---------------------------------------------------------------------------
def bottleneck_forward(x_nchw, params, C, k=3):
    N, Ci, H, W = x_nchw.shape
    assert Ci == C // 2
    x = x_nchw.transpose(0, 2, 3, 1)                    # NHWC once, at the boundary
    R = N * H * W

    p_in, _, _ = _im2col_nhwc(x, k, pad=1)              # (R, 9*Ci)

    # skip = conv3x3(x) + bias  (pre-activation branch)
    skip, _ = _matmul_rows(p_in, params["w_skip"], params["b_skip"])

    # out = bn1(relu(conv1(x)))  -- fused conv+bias+relu kernel + per-tile stats
    y1, st1 = _matmul_rows(p_in, params["w1"], params["b1"], with_stats=True)
    scale1, shift1 = _bn_scale_shift(st1, R, C, params["g1"], params["bt1"])
    out1 = (y1[:R, :C] * scale1 + shift1).reshape(N, H, W, C)   # BN apply, XLA-fused

    # out = bn2(relu(conv2(out) + skip))
    p2, _, _ = _im2col_nhwc(out1, k, pad=1)             # (R, 9*C)
    y2, st2 = _matmul_rows(p2, params["w2"], params["b2"], skip=skip, with_stats=True)
    scale2, shift2 = _bn_scale_shift(st2, R, C, params["g2"], params["bt2"])
    out2 = (y2[:R, :C] * scale2 + shift2).reshape(N, H, W, C)

    # out = deconv(out): stride-2 ConvTranspose2d via sub-pixel phase matmul
    pd = _deconv_taps_nhwc(out2)                        # (R, 4*C)
    yd, _ = _matmul_rows(pd, params["w_deconv"], params["b_deconv"])
    Cop = params["w_deconv"].shape[1] // 4
    yd = yd[:R].reshape(N, H, W, 4, Cop)[..., :Ci]      # strip channel padding
    yd = yd.reshape(N, H, W, 2, 2, Ci).transpose(0, 1, 3, 2, 4, 5)
    yd = yd.reshape(N, 2 * H, 2 * W, Ci)
    return yd.transpose(0, 3, 1, 2)                     # back to NCHW


if __name__ == "__main__":
    C = 8                        # bottle_neck_channels
    N, H, W = 2, 16, 16
    key = jax.random.PRNGKey(0)
    kx, kp = jax.random.split(key)
    x = jax.random.normal(kx, (N, C // 2, H, W), jnp.float32)     # NCHW, like PyTorch
    params = make_params(kp, C)

    fwd = jax.jit(functools.partial(bottleneck_forward, C=C))
    out = fwd(x, params)
    jax.block_until_ready(out)
    assert out.shape == (N, C // 2, 2 * H, 2 * W), out.shape
    assert bool(jnp.all(jnp.isfinite(out)))
    print("KERNEL_OK")
</pallas_src>

<mosaic_0001>
module attributes {stable_mosaic.version = 11 : i64} {
  func.func @_mm_bias_kernel(%arg0: i32, %arg1: memref<256x128xbf16, #tpu.memory_space<vmem>>, %arg2: memref<128x128xbf16, #tpu.memory_space<vmem>>, %arg3: memref<1x128xf32, #tpu.memory_space<vmem>>, %arg4: memref<256x128xf32, #tpu.memory_space<vmem>>) attributes {dimension_semantics = [#tpu.dimension_semantics<parallel>], iteration_bounds = array<i64: 2>, scalar_prefetch = 0 : i64, scratch_operands = 0 : i64, tpu.core_type = #tpu.core_type<tc>, window_params = [{transform_indices = @transform_0, window_bounds = array<i64: 256, 128>}, {pipeline_mode = #tpu.pipeline_mode<synchronous>, transform_indices = @transform_1, window_bounds = array<i64: 128, 128>}, {pipeline_mode = #tpu.pipeline_mode<synchronous>, transform_indices = @transform_2, window_bounds = array<i64: 1, 128>}, {transform_indices = @transform_3, window_bounds = array<i64: 256, 128>}]} {
    %c0 = arith.constant 0 : index
    %c0_0 = arith.constant 0 : index
    %0 = vector.load %arg1[%c0, %c0_0] : memref<256x128xbf16, #tpu.memory_space<vmem>>, vector<256x128xbf16>
    %c0_1 = arith.constant 0 : index
    %c0_2 = arith.constant 0 : index
    %1 = vector.load %arg2[%c0_1, %c0_2] : memref<128x128xbf16, #tpu.memory_space<vmem>>, vector<128x128xbf16>
    %cst = arith.constant dense<0.000000e+00> : vector<256x128xf32>
    %2 = tpu.matmul %0, %1, %cst {dimension_numbers = #tpu.dot_dimension_numbers<[1], [0], [0], [1], [0, 0, 1, 1], [], []>} : vector<256x128xbf16>, vector<128x128xbf16>, vector<256x128xf32> -> vector<256x128xf32>
    %c0_3 = arith.constant 0 : index
    %c0_4 = arith.constant 0 : index
    %3 = vector.load %arg3[%c0_3, %c0_4] : memref<1x128xf32, #tpu.memory_space<vmem>>, vector<1x128xf32>
    %4 = vector.broadcast %3 : vector<1x128xf32> to vector<256x128xf32>
    %5 = arith.addf %2, %4 : vector<256x128xf32>
    %c0_5 = arith.constant 0 : index
    %c0_6 = arith.constant 0 : index
    %6 = vector.load %arg4[%c0_5, %c0_6] : memref<256x128xf32, #tpu.memory_space<vmem>>, vector<256x128xf32>
    tpu.vector_store %arg4[%c0_5, %c0_6], %5 {strides = array<i32>} : memref<256x128xf32, #tpu.memory_space<vmem>>, vector<256x128xf32>,
    return
  }
  func.func @transform_0(%arg0: i32) -> (i32, i32) {
    %c0_i32 = arith.constant 0 : i32
    %c0_i32_0 = arith.constant 0 : i32
    return %arg0, %c0_i32 : i32, i32
  }
  func.func @transform_1(%arg0: i32) -> (i32, i32) {
    %c0_i32 = arith.constant 0 : i32
    %c0_i32_0 = arith.constant 0 : i32
    %c0_i32_1 = arith.constant 0 : i32
    return %c0_i32, %c0_i32_0 : i32, i32
  }
  func.func @transform_2(%arg0: i32) -> (i32, i32) {
    %c0_i32 = arith.constant 0 : i32
    %c0_i32_0 = arith.constant 0 : i32
    %c0_i32_1 = arith.constant 0 : i32
    return %c0_i32, %c0_i32_0 : i32, i32
  }
  func.func @transform_3(%arg0: i32) -> (i32, i32) {
    %c0_i32 = arith.constant 0 : i32
    %c0_i32_0 = arith.constant 0 : i32
    return %arg0, %c0_i32 : i32, i32
  }
}

module attributes {stable_mosaic.version = 11 : i64} {
  func.func @_mm_bias_relu_stats_kernel(%arg0: i32, %arg1: memref<256x128xbf16, #tpu.memory_space<vmem>>, %arg2: memref<128x128xbf16, #tpu.memory_space<vmem>>, %arg3: memref<1x128xf32, #tpu.memory_space<vmem>>, %arg4: memref<256x128xf32, #tpu.memory_space<vmem>>, %arg5: memref<8x256xf32, #tpu.memory_space<vmem>>) attributes {dimension_semantics = [#tpu.dimension_semantics<parallel>], iteration_bounds = array<i64: 2>, scalar_prefetch = 0 : i64, scratch_operands = 0 : i64, tpu.core_type = #tpu.core_type<tc>, window_params = [{transform_indices = @transform_0, window_bounds = array<i64: 256, 128>}, {pipeline_mode = #tpu.pipeline_mode<synchronous>, transform_indices = @transform_1, window_bounds = array<i64: 128, 128>}, {pipeline_mode = #tpu.pipeline_mode<synchronous>, transform_indices = @transform_2, window_bounds = array<i64: 1, 128>}, {transform_indices = @transform_3, window_bounds = array<i64: 256, 128>}, {transform_indices = @transform_4, window_bounds = array<i64: 8, 256>}]} {
    %c0 = arith.constant 0 : index
    %c0_0 = arith.constant 0 : index
    %0 = vector.load %arg1[%c0, %c0_0] : memref<256x128xbf16, #tpu.memory_space<vmem>>, vector<256x128xbf16>
    %c0_1 = arith.constant 0 : index
    %c0_2 = arith.constant 0 : index
    %1 = vector.load %arg2[%c0_1, %c0_2] : memref<128x128xbf16, #tpu.memory_space<vmem>>, vector<128x128xbf16>
    %cst = arith.constant dense<0.000000e+00> : vector<256x128xf32>
    %2 = tpu.matmul %0, %1, %cst {dimension_numbers = #tpu.dot_dimension_numbers<[1], [0], [0], [1], [0, 0, 1, 1], [], []>} : vector<256x128xbf16>, vector<128x128xbf16>, vector<256x128xf32> -> vector<256x128xf32>
    %c0_3 = arith.constant 0 : index
    %c0_4 = arith.constant 0 : index
    %3 = vector.load %arg3[%c0_3, %c0_4] : memref<1x128xf32, #tpu.memory_space<vmem>>, vector<1x128xf32>
    %4 = vector.broadcast %3 : vector<1x128xf32> to vector<256x128xf32>
    %5 = arith.addf %2, %4 : vector<256x128xf32>
    %cst_5 = arith.constant 0.000000e+00 : f32
    %6 = vector.broadcast %cst_5 : f32 to vector<256x128xf32>
    %7 = arith.maximumf %5, %6 : vector<256x128xf32>
    %c0_6 = arith.constant 0 : index
    %c0_7 = arith.constant 0 : index
    %8 = vector.load %arg4[%c0_6, %c0_7] : memref<256x128xf32, #tpu.memory_space<vmem>>, vector<256x128xf32>
    tpu.vector_store %arg4[%c0_6, %c0_7], %7 {strides = array<i32>} : memref<256x128xf32, #tpu.memory_space<vmem>>, vector<256x128xf32>,
    %c256_i32 = arith.constant 256 : i32
    %9 = arith.muli %arg0, %c256_i32 : i32
    %10 = tpu.iota {dimensions = array<i32: 0>} : vector<256x1xi32>
    %11 = vector.broadcast %9 : i32 to vector<256x1xi32>
    %12 = arith.addi %11, %10 : vector<256x1xi32>
    %c512_i32 = arith.constant 512 : i32
    %13 = vector.broadcast %c512_i32 : i32 to vector<256x1xi32>
    %14 = arith.cmpi slt, %12, %13 : vector<256x1xi32>
    %cst_8 = arith.constant 0.000000e+00 : f32
    %15 = vector.shape_cast %14 : vector<256x1xi1> to vector<256x1xi1>
    %16 = vector.broadcast %15 : vector<256x1xi1> to vector<256x128xi1>
    %17 = vector.broadcast %cst_8 : f32 to vector<256x128xf32>
    %18 = arith.select %16, %7, %17 : vector<256x128xi1>, vector<256x128xf32>
    %cst_9 = arith.constant dense<0.000000e+00> : vector<128xf32>
    %19 = vector.multi_reduction <add>, %18, %cst_9 [0] : vector<256x128xf32> to vector<128xf32>
    %20 = vector.shape_cast %19 : vector<128xf32> to vector<1x128xf32>
    %21 = arith.mulf %18, %18 : vector<256x128xf32>
    %cst_10 = arith.constant dense<0.000000e+00> : vector<128xf32>
    %22 = vector.multi_reduction <add>, %21, %cst_10 [0] : vector<256x128xf32> to vector<128xf32>
    %23 = vector.shape_cast %22 : vector<128xf32> to vector<1x128xf32>
    %24 = vector.shape_cast %20 : vector<1x128xf32> to vector<1x128xf32>
    %25 = vector.broadcast %24 : vector<1x128xf32> to vector<8x128xf32>
    %c0_11 = arith.constant 0 : index
    %c0_12 = arith.constant 0 : index
    %26 = vector.load %arg5[%c0_11, %c0_12] : memref<8x256xf32, #tpu.memory_space<vmem>>, vector<8x128xf32>
    tpu.vector_store %arg5[%c0_11, %c0_12], %25 {strides = array<i32>} : memref<8x256xf32, #tpu.memory_space<vmem>>, vector<8x128xf32>,
    %27 = vector.shape_cast %23 : vector<1x128xf32> to vector<1x128xf32>
    %28 = vector.broadcast %27 : vector<1x128xf32> to vector<8x128xf32>
    %c0_13 = arith.constant 0 : index
    %c128 = arith.constant 128 : index
    %29 = vector.load %arg5[%c0_13, %c128] : memref<8x256xf32, #tpu.memory_space<vmem>>, vector<8x128xf32>
    tpu.vector_store %arg5[%c0_13, %c128], %28 {strides = array<i32>} : memref<8x256xf32, #tpu.memory_space<vmem>>, vector<8x128xf32>,
    return
  }
  func.func @transform_0(%arg0: i32) -> (i32, i32) {
    %c0_i32 = arith.constant 0 : i32
    %c0_i32_0 = arith.constant 0 : i32
    return %arg0, %c0_i32 : i32, i32
  }
  func.func @transform_1(%arg0: i32) -> (i32, i32) {
    %c0_i32 = arith.constant 0 : i32
    %c0_i32_0 = arith.constant 0 : i32
    %c0_i32_1 = arith.constant 0 : i32
    return %c0_i32, %c0_i32_0 : i32, i32
  }
  func.func @transform_2(%arg0: i32) -> (i32, i32) {
    %c0_i32 = arith.constant 0 : i32
    %c0_i32_0 = arith.constant 0 : i32
    %c0_i32_1 = arith.constant 0 : i32
    return %c0_i32, %c0_i32_0 : i32, i32
  }
  func.func @transform_3(%arg0: i32) -> (i32, i32) {
    %c0_i32 = arith.constant 0 : i32
    %c0_i32_0 = arith.constant 0 : i32
    return %arg0, %c0_i32 : i32, i32
  }
  func.func @transform_4(%arg0: i32) -> (i32, i32) {
    %c0_i32 = arith.constant 0 : i32
    %c0_i32_0 = arith.constant 0 : i32
    return %arg0, %c0_i32 : i32, i32
  }
}

module attributes {stable_mosaic.version = 11 : i64} {
  func.func @_mm_bias_skip_relu_stats_kernel(%arg0: i32, %arg1: memref<256x128xbf16, #tpu.memory_space<vmem>>, %arg2: memref<128x128xbf16, #tpu.memory_space<vmem>>, %arg3: memref<1x128xf32, #tpu.memory_space<vmem>>, %arg4: memref<256x128xf32, #tpu.memory_space<vmem>>, %arg5: memref<256x128xf32, #tpu.memory_space<vmem>>, %arg6: memref<8x256xf32, #tpu.memory_space<vmem>>) attributes {dimension_semantics = [#tpu.dimension_semantics<parallel>], iteration_bounds = array<i64: 2>, scalar_prefetch = 0 : i64, scratch_operands = 0 : i64, tpu.core_type = #tpu.core_type<tc>, window_params = [{transform_indices = @transform_0, window_bounds = array<i64: 256, 128>}, {pipeline_mode = #tpu.pipeline_mode<synchronous>, transform_indices = @transform_1, window_bounds = array<i64: 128, 128>}, {pipeline_mode = #tpu.pipeline_mode<synchronous>, transform_indices = @transform_2, window_bounds = array<i64: 1, 128>}, {transform_indices = @transform_3, window_bounds = array<i64: 256, 128>}, {transform_indices = @transform_4, window_bounds = array<i64: 256, 128>}, {transform_indices = @transform_5, window_bounds = array<i64: 8, 256>}]} {
    %c0 = arith.constant 0 : index
    %c0_0 = arith.constant 0 : index
    %0 = vector.load %arg1[%c0, %c0_0] : memref<256x128xbf16, #tpu.memory_space<vmem>>, vector<256x128xbf16>
    %c0_1 = arith.constant 0 : index
    %c0_2 = arith.constant 0 : index
    %1 = vector.load %arg2[%c0_1, %c0_2] : memref<128x128xbf16, #tpu.memory_space<vmem>>, vector<128x128xbf16>
    %cst = arith.constant dense<0.000000e+00> : vector<256x128xf32>
    %2 = tpu.matmul %0, %1, %cst {dimension_numbers = #tpu.dot_dimension_numbers<[1], [0], [0], [1], [0, 0, 1, 1], [], []>} : vector<256x128xbf16>, vector<128x128xbf16>, vector<256x128xf32> -> vector<256x128xf32>
    %c0_3 = arith.constant 0 : index
    %c0_4 = arith.constant 0 : index
    %3 = vector.load %arg3[%c0_3, %c0_4] : memref<1x128xf32, #tpu.memory_space<vmem>>, vector<1x128xf32>
    %4 = vector.broadcast %3 : vector<1x128xf32> to vector<256x128xf32>
    %5 = arith.addf %2, %4 : vector<256x128xf32>
    %c0_5 = arith.constant 0 : index
    %c0_6 = arith.constant 0 : index
    %6 = vector.load %arg4[%c0_5, %c0_6] : memref<256x128xf32, #tpu.memory_space<vmem>>, vector<256x128xf32>
    %7 = arith.addf %5, %6 : vector<256x128xf32>
    %cst_7 = arith.constant 0.000000e+00 : f32
    %8 = vector.broadcast %cst_7 : f32 to vector<256x128xf32>
    %9 = arith.maximumf %7, %8 : vector<256x128xf32>
    %c0_8 = arith.constant 0 : index
    %c0_9 = arith.constant 0 : index
    %10 = vector.load %arg5[%c0_8, %c0_9] : memref<256x128xf32, #tpu.memory_space<vmem>>, vector<256x128xf32>
    tpu.vector_store %arg5[%c0_8, %c0_9], %9 {strides = array<i32>} : memref<256x128xf32, #tpu.memory_space<vmem>>, vector<256x128xf32>,
    %c256_i32 = arith.constant 256 : i32
    %11 = arith.muli %arg0, %c256_i32 : i32
    %12 = tpu.iota {dimensions = array<i32: 0>} : vector<256x1xi32>
    %13 = vector.broadcast %11 : i32 to vector<256x1xi32>
    %14 = arith.addi %13, %12 : vector<256x1xi32>
    %c512_i32 = arith.constant 512 : i32
    %15 = vector.broadcast %c512_i32 : i32 to vector<256x1xi32>
    %16 = arith.cmpi slt, %14, %15 : vector<256x1xi32>
    %cst_10 = arith.constant 0.000000e+00 : f32
    %17 = vector.shape_cast %16 : vector<256x1xi1> to vector<256x1xi1>
    %18 = vector.broadcast %17 : vector<256x1xi1> to vector<256x128xi1>
    %19 = vector.broadcast %cst_10 : f32 to vector<256x128xf32>
    %20 = arith.select %18, %9, %19 : vector<256x128xi1>, vector<256x128xf32>
    %cst_11 = arith.constant dense<0.000000e+00> : vector<128xf32>
    %21 = vector.multi_reduction <add>, %20, %cst_11 [0] : vector<256x128xf32> to vector<128xf32>
    %22 = vector.shape_cast %21 : vector<128xf32> to vector<1x128xf32>
    %23 = arith.mulf %20, %20 : vector<256x128xf32>
    %cst_12 = arith.constant dense<0.000000e+00> : vector<128xf32>
    %24 = vector.multi_reduction <add>, %23, %cst_12 [0] : vector<256x128xf32> to vector<128xf32>
    %25 = vector.shape_cast %24 : vector<128xf32> to vector<1x128xf32>
    %26 = vector.shape_cast %22 : vector<1x128xf32> to vector<1x128xf32>
    %27 = vector.broadcast %26 : vector<1x128xf32> to vector<8x128xf32>
    %c0_13 = arith.constant 0 : index
    %c0_14 = arith.constant 0 : index
    %28 = vector.load %arg6[%c0_13, %c0_14] : memref<8x256xf32, #tpu.memory_space<vmem>>, vector<8x128xf32>
    tpu.vector_store %arg6[%c0_13, %c0_14], %27 {strides = array<i32>} : memref<8x256xf32, #tpu.memory_space<vmem>>, vector<8x128xf32>,
    %29 = vector.shape_cast %25 : vector<1x128xf32> to vector<1x128xf32>
    %30 = vector.broadcast %29 : vector<1x128xf32> to vector<8x128xf32>
    %c0_15 = arith.constant 0 : index
    %c128 = arith.constant 128 : index
    %31 = vector.load %arg6[%c0_15, %c128] : memref<8x256xf32, #tpu.memory_space<vmem>>, vector<8x128xf32>
    tpu.vector_store %arg6[%c0_15, %c128], %30 {strides = array<i32>} : memref<8x256xf32, #tpu.memory_space<vmem>>, vector<8x128xf32>,
    return
  }
  func.func @transform_0(%arg0: i32) -> (i32, i32) {
    %c0_i32 = arith.constant 0 : i32
    %c0_i32_0 = arith.constant 0 : i32
    return %arg0, %c0_i32 : i32, i32
  }
  func.func @transform_1(%arg0: i32) -> (i32, i32) {
    %c0_i32 = arith.constant 0 : i32
    %c0_i32_0 = arith.constant 0 : i32
    %c0_i32_1 = arith.constant 0 : i32
    return %c0_i32, %c0_i32_0 : i32, i32
  }
  func.func @transform_2(%arg0: i32) -> (i32, i32) {
    %c0_i32 = arith.constant 0 : i32
    %c0_i32_0 = arith.constant 0 : i32
    %c0_i32_1 = arith.constant 0 : i32
    return %c0_i32, %c0_i32_0 : i32, i32
  }
  func.func @transform_3(%arg0: i32) -> (i32, i32) {
    %c0_i32 = arith.constant 0 : i32
    %c0_i32_0 = arith.constant 0 : i32
    return %arg0, %c0_i32 : i32, i32
  }
  func.func @transform_4(%arg0: i32) -> (i32, i32) {
    %c0_i32 = arith.constant 0 : i32
    %c0_i32_0 = arith.constant 0 : i32
    return %arg0, %c0_i32 : i32, i32
  }
  func.func @transform_5(%arg0: i32) -> (i32, i32) {
    %c0_i32 = arith.constant 0 : i32
    %c0_i32_0 = arith.constant 0 : i32
    return %arg0, %c0_i32 : i32, i32
  }
}

module attributes {stable_mosaic.version = 11 : i64} {
  func.func @_mm_bias_kernel(%arg0: i32, %arg1: memref<256x128xbf16, #tpu.memory_space<vmem>>, %arg2: memref<128x512xbf16, #tpu.memory_space<vmem>>, %arg3: memref<1x512xf32, #tpu.memory_space<vmem>>, %arg4: memref<256x512xf32, #tpu.memory_space<vmem>>) attributes {dimension_semantics = [#tpu.dimension_semantics<parallel>], iteration_bounds = array<i64: 2>, scalar_prefetch = 0 : i64, scratch_operands = 0 : i64, tpu.core_type = #tpu.core_type<tc>, window_params = [{transform_indices = @transform_0, window_bounds = array<i64: 256, 128>}, {pipeline_mode = #tpu.pipeline_mode<synchronous>, transform_indices = @transform_1, window_bounds = array<i64: 128, 512>}, {pipeline_mode = #tpu.pipeline_mode<synchronous>, transform_indices = @transform_2, window_bounds = array<i64: 1, 512>}, {transform_indices = @transform_3, window_bounds = array<i64: 256, 512>}]} {
    %c0 = arith.constant 0 : index
    %c0_0 = arith.constant 0 : index
    %0 = vector.load %arg1[%c0, %c0_0] : memref<256x128xbf16, #tpu.memory_space<vmem>>, vector<256x128xbf16>
    %c0_1 = arith.constant 0 : index
    %c0_2 = arith.constant 0 : index
    %1 = vector.load %arg2[%c0_1, %c0_2] : memref<128x512xbf16, #tpu.memory_space<vmem>>, vector<128x512xbf16>
    %cst = arith.constant dense<0.000000e+00> : vector<256x512xf32>
    %2 = tpu.matmul %0, %1, %cst {dimension_numbers = #tpu.dot_dimension_numbers<[1], [0], [0], [1], [0, 0, 1, 1], [], []>} : vector<256x128xbf16>, vector<128x512xbf16>, vector<256x512xf32> -> vector<256x512xf32>
    %c0_3 = arith.constant 0 : index
    %c0_4 = arith.constant 0 : index
    %3 = vector.load %arg3[%c0_3, %c0_4] : memref<1x512xf32, #tpu.memory_space<vmem>>, vector<1x512xf32>
    %4 = vector.broadcast %3 : vector<1x512xf32> to vector<256x512xf32>
    %5 = arith.addf %2, %4 : vector<256x512xf32>
    %c0_5 = arith.constant 0 : index
    %c0_6 = arith.constant 0 : index
    %6 = vector.load %arg4[%c0_5, %c0_6] : memref<256x512xf32, #tpu.memory_space<vmem>>, vector<256x512xf32>
    tpu.vector_store %arg4[%c0_5, %c0_6], %5 {strides = array<i32>} : memref<256x512xf32, #tpu.memory_space<vmem>>, vector<256x512xf32>,
    return
  }
  func.func @transform_0(%arg0: i32) -> (i32, i32) {
    %c0_i32 = arith.constant 0 : i32
    %c0_i32_0 = arith.constant 0 : i32
    return %arg0, %c0_i32 : i32, i32
  }
  func.func @transform_1(%arg0: i32) -> (i32, i32) {
    %c0_i32 = arith.constant 0 : i32
    %c0_i32_0 = arith.constant 0 : i32
    %c0_i32_1 = arith.constant 0 : i32
    return %c0_i32, %c0_i32_0 : i32, i32
  }
  func.func @transform_2(%arg0: i32) -> (i32, i32) {
    %c0_i32 = arith.constant 0 : i32
    %c0_i32_0 = arith.constant 0 : i32
    %c0_i32_1 = arith.constant 0 : i32
    return %c0_i32, %c0_i32_0 : i32, i32
  }
  func.func @transform_3(%arg0: i32) -> (i32, i32) {
    %c0_i32 = arith.constant 0 : i32
    %c0_i32_0 = arith.constant 0 : i32
    return %arg0, %c0_i32 : i32, i32
  }
}

</mosaic_0001>

<bundles_post_ra>
// kernel: bottleneck_forward.4
= control target key start
LH: loop header
LB: loop body
LE: loop exit
PB: predicated region body
PF: predicated region fallthrough
CT: control target
= control target key end

     0   :  { %s807_s12 = smov 0   ;;  %s941_s0 = inlined_call_operand.vmem [shape: bf16[512,128], index: 0, kind: input, shape index: {}]   ;;  %s942_s1 = inlined_call_operand.vmem [shape: bf16[128,128], index: 1, kind: input, shape index: {}]   ;;  %s943_s2 = inlined_call_operand.vmem [shape: f32[1,128], index: 2, kind: input, shape index: {}]   ;;  %s944_s3 = inlined_call_operand.vmem [shape: f32[512,128], index: 3, kind: output, shape index: {}]  }
   0x1 LB: > { %s623_s13 = sadd.s32 4294967295, %s785_s12   ;;  %p627_p0 = scmp.ge.s32.totalorder %s785_s12, 1  ;;  %s785_s12 = sphi %s807_s12, %s13_s12  }
   0x2   : > { %p138_p1 = scmp.lt.s32.totalorder %s785_s12, 3 }
   0x4   : > { %p139_p2 = pnand %p627_p0, %p138_p1 }
   0x5   : > { %s628_s16 = sshll.u32 (!%p139_p2), %s623_s13, 5 }
   0x6   : > { %142 = sbr.rel (%p139_p2) target bundleno = 270 (0x10e), region = 32  ;;  %p163_p3 = scmp.lt.s32.totalorder (!%p139_p2), %s628_s16, 63 }
   0xb   : > { %v755_v0 = vld [vmem:[%s942_s1 + $0x38] sm:$0xff]   ;;  %v756_v1 = vld [vmem:[%s942_s1 + $0x30] sm:$0xff]   ;;  %s946_s16 = smov (!%p163_p3, %s628_s16), 63  ;;  %v757_v2 = vld [vmem:[%s942_s1 + $0x28] sm:$0xff]  }
   0xc   : > { %683 = vmatprep.subr.bf16.mxu0 %v755_v0  ;;  %731 = vmatprep.subr.bf16.mxu1 %v755_v0  ;;  %s629_s21 = sshll.u32 %s946_s16, 2  ;;  %v758_v3 = vld [vmem:[%s942_s1 + $0x20] sm:$0xff]   ;;  %v759_v6 = vld [vmem:[%s942_s1 + $0x18] sm:$0xff]   ;;  %v760_v7 = vld [vmem:[%s942_s1 + $0x10] sm:$0xff]   ;;  %s631_s8 = sshll.u32 %s946_s16, 3 }
   0xd   : > { %684 = vmatpush3.bf16.msra.mxu0 %v755_v0  ;;  %739 = vmatpush3.bf16.msra.mxu1 %v755_v0  ;;  %s830_s24 = scalar_lea.vmem %s941_s0, %s629_s21  ;;  %v761_v8 = vld [vmem:[%s942_s1 + $0x8] sm:$0xff]   ;;  %v762_v9 = vld [vmem:[%s942_s1] sm:$0xff]   ;;  %s872_s14 = scalar_lea.vmem %s944_s3, %s631_s8 }
   0xe   : > { %685 = vmatprep.subr.bf16.mxu0 %v756_v1  ;;  %732 = vmatprep.subr.bf16.mxu1 %v756_v1  ;;  %v763_v4 = vld [vmem:[%s830_s24] sm:$0xff]   ;;  %v765_v10 = vld [vmem:[%s830_s24 + $0x8] sm:$0xff]   ;;  %v767_v12 = vld [vmem:[%s830_s24 + $0x10] sm:$0xff]  }
   0xf   : > { %v764_v5 = vld [vmem:[%s830_s24 + $0x40] sm:$0xff]   ;;  %699 = vmatprep.mubr.bf16.mxu0 %v763_v4  ;;  %v766_v11 = vld [vmem:[%s830_s24 + $0x48] sm:$0xff]   ;;  %v768_v13 = vld [vmem:[%s830_s24 + $0x50] sm:$0xff]  }
  0x10   : > { %715 = vmatprep.mubr.bf16.mxu1 %v764_v5  ;;  %v769_v14 = vld [vmem:[%s830_s24 + $0x18] sm:$0xff]   ;;  %v771_v16 = vld [vmem:[%s830_s24 + $0x20] sm:$0xff]   ;;  %v773_v18 = vld [vmem:[%s830_s24 + $0x28] sm:$0xff]  }
  0x11   : > { %686 = vmatpush3.bf16.msra.mxu0 %v756_v1  ;;  %740 = vmatpush3.bf16.msra.mxu1 %v756_v1  ;;  %v770_v15 = vld [vmem:[%s830_s24 + $0x58] sm:$0xff]   ;;  %v772_v17 = vld [vmem:[%s830_s24 + $0x60] sm:$0xff]   ;;  %v774_v19 = vld [vmem:[%s830_s24 + $0x68] sm:$0xff]  }
  0x12   : > { %687 = vmatprep.subr.bf16.mxu0 %v757_v2  ;;  %733 = vmatprep.subr.bf16.mxu1 %v757_v2  ;;  %v775_v20 = vld [vmem:[%s830_s24 + $0x30] sm:$0xff]   ;;  %v777_v22 = vld [vmem:[%s830_s24 + $0x38] sm:$0xff]   ;;  %v867_v24 = vld [vmem:[%s943_s2] ss:$0 sm:$0xff] }
  0x13   : > { %v776_v21 = vld [vmem:[%s830_s24 + $0x70] sm:$0xff]   ;;  %v778_v23 = vld [vmem:[%s830_s24 + $0x78] sm:$0xff]  }
  0x15   : > { %688 = vmatpush3.bf16.msra.mxu0 %v757_v2  ;;  %741 = vmatpush3.bf16.msra.mxu1 %v757_v2 }
  0x16   : > { %689 = vmatprep.subr.bf16.mxu0 %v758_v3  ;;  %734 = vmatprep.subr.bf16.mxu1 %v758_v3 }
  0x19   : > { %690 = vmatpush3.bf16.msra.mxu0 %v758_v3  ;;  %742 = vmatpush3.bf16.msra.mxu1 %v758_v3 }
  0x1a   : > { %691 = vmatprep.subr.bf16.mxu0 %v759_v6  ;;  %735 = vmatprep.subr.bf16.mxu1 %v759_v6 }
  0x1d   : > { %692 = vmatpush3.bf16.msra.mxu0 %v759_v6  ;;  %743 = vmatpush3.bf16.msra.mxu1 %v759_v6 }
  0x1e   : > { %693 = vmatprep.subr.bf16.mxu0 %v760_v7  ;;  %736 = vmatprep.subr.bf16.mxu1 %v760_v7 }
  0x21   : > { %694 = vmatpush3.bf16.msra.mxu0 %v760_v7  ;;  %744 = vmatpush3.bf16.msra.mxu1 %v760_v7 }
  0x22   : > { %695 = vmatprep.subr.bf16.mxu0 %v761_v8  ;;  %737 = vmatprep.subr.bf16.mxu1 %v761_v8 }
  0x25   : > { %696 = vmatpush3.bf16.msra.mxu0 %v761_v8  ;;  %745 = vmatpush3.bf16.msra.mxu1 %v761_v8 }
  0x26   : > { %697 = vmatprep.subr.bf16.mxu0 %v762_v9  ;;  %738 = vmatprep.subr.bf16.mxu1 %v762_v9 }
  0x29   : > { %698 = vmatpush3.bf16.msra.mxu0 %v762_v9  ;;  %746 = vmatpush3.bf16.msra.mxu1 %v762_v9 }
  0x2c   : > { %700 = vmatmul.mubr.bf16.vlgmr.msra.gmra.mxu0 %v765_v10  ;;  %716 = vmatmul.mubr.bf16.vlgmr.msra.gmra.mxu1 %v766_v11 }
  0x2d   : > { %703 = vmatprep.mubr.bf16.mxu0 %v767_v12  ;;  %719 = vmatprep.mubr.bf16.mxu1 %v768_v13 }
  0x34   : > { %704 = vmatmul.mubr.bf16.gmra.mxu0 %v769_v14  ;;  %720 = vmatmul.mubr.bf16.gmra.mxu1 %v770_v15 }
  0x35   : > { %707 = vmatprep.mubr.bf16.mxu0 %v771_v16  ;;  %723 = vmatprep.mubr.bf16.mxu1 %v772_v17 }
  0x3c   : > { %708 = vmatmul.mubr.bf16.gmra.mxu0 %v773_v18  ;;  %724 = vmatmul.mubr.bf16.gmra.mxu1 %v774_v19 }
  0x3d   : > { %711 = vmatprep.mubr.bf16.mxu0 %v775_v20  ;;  %727 = vmatprep.mubr.bf16.mxu1 %v776_v21 }
  0x44   : > { %712 = vmatmul.mubr.bf16.gmra.mxu0 %v777_v22  ;;  %728 = vmatmul.mubr.bf16.gmra.mxu1 %v778_v23 }
  0xec   : > { %v701_v25 = vpop.f32.mrf.mxu0  ;;  %v717_v26 = vpop.f32.mrf.mxu1 }
  0xed   : > { %v417_v27 = vadd.f32 %v701_v25, %v867_v24  ;;  %v481_v28 = vadd.f32 %v717_v26, %v867_v24 }
  0xee   : > { %v408_v29 = vpop.f32.mrf.mxu0  ;;  %v472_v30 = vpop.f32.mrf.mxu1 }
  0xef   : > { %537 = vst [vmem:[%s872_s14 + $0x10] sm:$0xff] %v417_v27  ;;  %553 = vst [vmem:[%s872_s14 + $0x90] sm:$0xff] %v481_v28  ;;  %v409_v31 = vadd.f32 %v867_v24, %v408_v29  ;;  %v473_v32 = vadd.f32 %v867_v24, %v472_v30 }
  0xf0   : > { %v702_v33 = vpop.f32.mrf.mxu0  ;;  %v718_v34 = vpop.f32.mrf.mxu1 }
  0xf1   : > { %535 = vst [vmem:[%s872_s14] sm:$0xff] %v409_v31  ;;  %551 = vst [vmem:[%s872_s14 + $0x80] sm:$0xff] %v473_v32  ;;  %v420_v35 = vadd.f32 %v702_v33, %v867_v24  ;;  %v484_v36 = vadd.f32 %v718_v34, %v867_v24 }
  0xf2   : > { %v411_v37 = vpop.f32.mrf.mxu0  ;;  %v475_v38 = vpop.f32.mrf.mxu1 }
  0xf3   : > { %538 = vst [vmem:[%s872_s14 + $0x18] sm:$0xff] %v420_v35  ;;  %554 = vst [vmem:[%s872_s14 + $0x98] sm:$0xff] %v484_v36  ;;  %v412_v39 = vadd.f32 %v867_v24, %v411_v37  ;;  %v476_v40 = vadd.f32 %v867_v24, %v475_v38 }
  0xf4   : > { %v705_v41 = vpop.f32.mrf.mxu0  ;;  %v721_v42 = vpop.f32.mrf.mxu1 }
  0xf5   : > { %536 = vst [vmem:[%s872_s14 + $0x8] sm:$0xff] %v412_v39  ;;  %552 = vst [vmem:[%s872_s14 + $0x88] sm:$0xff] %v476_v40  ;;  %v433_v43 = vadd.f32 %v705_v41, %v867_v24  ;;  %v497_v44 = vadd.f32 %v721_v42, %v867_v24 }
  0xf6   : > { %v424_v45 = vpop.f32.mrf.mxu0  ;;  %v488_v46 = vpop.f32.mrf.mxu1 }
  0xf7   : > { %541 = vst [vmem:[%s872_s14 + $0x30] sm:$0xff] %v433_v43  ;;  %557 = vst [vmem:[%s872_s14 + $0xb0] sm:$0xff] %v497_v44  ;;  %v425_v47 = vadd.f32 %v867_v24, %v424_v45  ;;  %v489_v48 = vadd.f32 %v867_v24, %v488_v46 }
  0xf8   : > { %v706_v49 = vpop.f32.mrf.mxu0  ;;  %v722_v50 = vpop.f32.mrf.mxu1 }
  0xf9   : > { %539 = vst [vmem:[%s872_s14 + $0x20] sm:$0xff] %v425_v47  ;;  %555 = vst [vmem:[%s872_s14 + $0xa0] sm:$0xff] %v489_v48  ;;  %v436_v51 = vadd.f32 %v706_v49, %v867_v24  ;;  %v500_v52 = vadd.f32 %v722_v50, %v867_v24 }
  0xfa   : > { %v427_v53 = vpop.f32.mrf.mxu0  ;;  %v491_v54 = vpop.f32.mrf.mxu1 }
  0xfb   : > { %542 = vst [vmem:[%s872_s14 + $0x38] sm:$0xff] %v436_v51  ;;  %558 = vst [vmem:[%s872_s14 + $0xb8] sm:$0xff] %v500_v52  ;;  %v428_v55 = vadd.f32 %v867_v24, %v427_v53  ;;  %v492_v56 = vadd.f32 %v867_v24, %v491_v54 }
  0xfc   : > { %v709_v57 = vpop.f32.mrf.mxu0  ;;  %v725_v58 = vpop.f32.mrf.mxu1 }
  0xfd   : > { %540 = vst [vmem:[%s872_s14 + $0x28] sm:$0xff] %v428_v55  ;;  %556 = vst [vmem:[%s872_s14 + $0xa8] sm:$0xff] %v492_v56  ;;  %v449_v59 = vadd.f32 %v709_v57, %v867_v24  ;;  %v513_v60 = vadd.f32 %v725_v58, %v867_v24 }
  0xfe   : > { %v440_v61 = vpop.f32.mrf.mxu0  ;;  %v504_v62 = vpop.f32.mrf.mxu1 }
  0xff   : > { %545 = vst [vmem:[%s872_s14 + $0x50] sm:$0xff] %v449_v59  ;;  %561 = vst [vmem:[%s872_s14 + $0xd0] sm:$0xff] %v513_v60  ;;  %v441_v63 = vadd.f32 %v867_v24, %v440_v61  ;;  %v505_v0 = vadd.f32 %v867_v24, %v504_v62 }
 0x100   : > { %v710_v1 = vpop.f32.mrf.mxu0  ;;  %v726_v2 = vpop.f32.mrf.mxu1 }
 0x101   : > { %543 = vst [vmem:[%s872_s14 + $0x40] sm:$0xff] %v441_v63  ;;  %559 = vst [vmem:[%s872_s14 + $0xc0] sm:$0xff] %v505_v0  ;;  %v452_v3 = vadd.f32 %v710_v1, %v867_v24  ;;  %v516_v4 = vadd.f32 %v726_v2, %v867_v24 }
 0x102   : > { %v443_v5 = vpop.f32.mrf.mxu0  ;;  %v507_v6 = vpop.f32.mrf.mxu1 }
 0x103   : > { %546 = vst [vmem:[%s872_s14 + $0x58] sm:$0xff] %v452_v3  ;;  %562 = vst [vmem:[%s872_s14 + $0xd8] sm:$0xff] %v516_v4  ;;  %v444_v7 = vadd.f32 %v867_v24, %v443_v5  ;;  %v508_v8 = vadd.f32 %v867_v24, %v507_v6 }
 0x104   : > { %v713_v9 = vpop.f32.mrf.mxu0  ;;  %v729_v10 = vpop.f32.mrf.mxu1 }
 0x105   : > { %544 = vst [vmem:[%s872_s14 + $0x48] sm:$0xff] %v444_v7  ;;  %560 = vst [vmem:[%s872_s14 + $0xc8] sm:$0xff] %v508_v8  ;;  %v465_v11 = vadd.f32 %v713_v9, %v867_v24  ;;  %v529_v12 = vadd.f32 %v729_v10, %v867_v24 }
 0x106   : > { %v456_v13 = vpop.f32.mrf.mxu0  ;;  %v520_v14 = vpop.f32.mrf.mxu1 }
 0x107   : > { %549 = vst [vmem:[%s872_s14 + $0x70] sm:$0xff] %v465_v11  ;;  %565 = vst [vmem:[%s872_s14 + $0xf0] sm:$0xff] %v529_v12  ;;  %v457_v15 = vadd.f32 %v867_v24, %v456_v13  ;;  %v521_v16 = vadd.f32 %v867_v24, %v520_v14 }
 0x108   : > { %v714_v17 = vpop.f32.mrf.mxu0  ;;  %v730_v18 = vpop.f32.mrf.mxu1 }
 0x109   : > { %547 = vst [vmem:[%s872_s14 + $0x60] sm:$0xff] %v457_v15  ;;  %563 = vst [vmem:[%s872_s14 + $0xe0] sm:$0xff] %v521_v16  ;;  %v468_v19 = vadd.f32 %v714_v17, %v867_v24  ;;  %v532_v20 = vadd.f32 %v730_v18, %v867_v24 }
 0x10a   : > { %v459_v21 = vpop.f32.mrf.mxu0  ;;  %v523_v22 = vpop.f32.mrf.mxu1 }
 0x10b   : > { %550 = vst [vmem:[%s872_s14 + $0x78] sm:$0xff] %v468_v19  ;;  %566 = vst [vmem:[%s872_s14 + $0xf8] sm:$0xff] %v532_v20  ;;  %v460_v23 = vadd.f32 %v867_v24, %v459_v21  ;;  %v524_v25 = vadd.f32 %v867_v24, %v523_v22 }
 0x10d   : > { %548 = vst [vmem:[%s872_s14 + $0x68] sm:$0xff] %v460_v23  ;;  %564 = vst [vmem:[%s872_s14 + $0xe8] sm:$0xff] %v524_v25 }
 0x10e PF: > { %s13_s12 = sadd.s32 1, %s785_s12  }
 0x10f   : > { %p10_p4 = scmp.ge.s32.totalorder %s13_s12, 4  }
 0x111   :  { %12 = sbr.rel (!%p10_p4) target bundleno = 1 (0x1), region = 62 }

// kernel: bottleneck_forward.5
= control target key start
LH: loop header
LB: loop body
LE: loop exit
PB: predicated region body
PF: predicated region fallthrough
CT: control target
= control target key end

     0   :  { %s1224_s15 = smov 0   ;;  %s1659_s0 = inlined_call_operand.vmem [shape: bf16[512,128], index: 0, kind: input, shape index: {}]   ;;  %s1660_s1 = inlined_call_operand.vmem [shape: bf16[128,128], index: 1, kind: input, shape index: {}]   ;;  %s1661_s2 = inlined_call_operand.vmem [shape: f32[1,128], index: 2, kind: input, shape index: {}]   ;;  %s1662_s3 = inlined_call_operand.vmem [shape: f32[512,128], index: 3, kind: output, shape index: {0}]   ;;  %s1663_s4 = inlined_call_operand.vmem [shape: f32[16,256], index: 4, kind: output, shape index: {1}]  }
   0x1 LB: > { %s1230_s16 = sadd.s32 4294967295, %s1197_s15   ;;  %p1035_p0 = scmp.ge.s32.totalorder %s1197_s15, 1  ;;  %s1197_s15 = sphi %s1224_s15, %s15_s15  }
   0x2   : > { %p166_p1 = scmp.lt.s32.totalorder %s1197_s15, 3 }
   0x4   : > { %p167_p2 = pnand %p1035_p0, %p166_p1 }
   0x5   : > { %s1036_s19 = sshll.u32 (!%p167_p2), %s1230_s16, 5  ;;  %s1067_s12 = sshll.u32 (!%p167_p2), %s1230_s16, 8 }
   0x6   : > { %170 = sbr.rel (%p167_p2) target bundleno = 325 (0x145), region = 32  ;;  %p198_p3 = scmp.lt.s32.totalorder (!%p167_p2), %s1036_s19, 63 }
   0x7   : > { %p209_p4 = scmp.lt.s32.totalorder (!%p167_p2), %s1230_s16, 1 }
   0xb   : > { %v1167_v0 = vld [vmem:[%s1660_s1 + $0x38] sm:$0xff]   ;;  %v1168_v1 = vld [vmem:[%s1660_s1 + $0x30] sm:$0xff]   ;;  %s1665_s19 = smov (!%p198_p3, %s1036_s19), 63  ;;  %v1169_v2 = vld [vmem:[%s1660_s1 + $0x28] sm:$0xff]   ;;  %v640_v24 = vlaneseq  ;;  %v1287_v27 = vstv %s1067_s12  ;;  %s1667_s16 = smov (!%p209_p4, %s1230_s16), 1 }
   0xc   : > { %1095 = vmatprep.subr.bf16.mxu0 %v1167_v0  ;;  %1143 = vmatprep.subr.bf16.mxu1 %v1167_v0  ;;  %s1037_s24 = sshll.u32 %s1665_s19, 2  ;;  %v1170_v3 = vld [vmem:[%s1660_s1 + $0x20] sm:$0xff]   ;;  %v1171_v5 = vld [vmem:[%s1660_s1 + $0x18] sm:$0xff]   ;;  %v1172_v6 = vld [vmem:[%s1660_s1 + $0x10] sm:$0xff]   ;;  %s1039_s17 = sshll.u32 %s1665_s19, 3 }
   0xd   : > { %1096 = vmatpush3.bf16.msra.mxu0 %v1167_v0  ;;  %1151 = vmatpush3.bf16.msra.mxu1 %v1167_v0  ;;  %s1250_s27 = scalar_lea.vmem %s1659_s0, %s1037_s24  ;;  %v1173_v8 = vld [vmem:[%s1660_s1 + $0x8] sm:$0xff]   ;;  %v1174_v9 = vld [vmem:[%s1660_s1] sm:$0xff]   ;;  %v1283_v25 = vshrl.u32 %v640_v24, 7  ;;  %s1329_s20 = scalar_lea.vmem %s1662_s3, %s1039_s17 }
   0xe   : > { %1097 = vmatprep.subr.bf16.mxu0 %v1168_v1  ;;  %1144 = vmatprep.subr.bf16.mxu1 %v1168_v1  ;;  %v1175_v4 = vld [vmem:[%s1250_s27] sm:$0xff]   ;;  %v1176_v10 = vld [vmem:[%s1250_s27 + $0x8] sm:$0xff]   ;;  %v1177_v12 = vld [vmem:[%s1250_s27 + $0x10] sm:$0xff]   ;;  %s1070_s21 = sshll.u32 %s1667_s16, 4 }
   0xf   : > { %1111 = vmatprep.mubr.bf16.mxu0 %v1175_v4  ;;  %v1183_v7 = vld [vmem:[%s1250_s27 + $0x40] sm:$0xff]   ;;  %v1184_v11 = vld [vmem:[%s1250_s27 + $0x48] sm:$0xff]   ;;  %v1185_v13 = vld [vmem:[%s1250_s27 + $0x50] sm:$0xff]   ;;  %v643_v26 = vadd.s32 16, %v1283_v25  ;;  %v642_v28 = vadd.s32 8, %v1283_v25  ;;  %v644_v29 = vadd.s32 24, %v1283_v25  ;;  %v1296_v31 = vadd.s32 %v1287_v27, %v1283_v25  ;;  %s213_s24 = scalar_lea.vmem %s1663_s4, %s1070_s21 }
  0x10   : > { %1127 = vmatprep.mubr.bf16.mxu1 %v1183_v7  ;;  %v1178_v14 = vld [vmem:[%s1250_s27 + $0x18] sm:$0xff]   ;;  %v1179_v16 = vld [vmem:[%s1250_s27 + $0x20] sm:$0xff]   ;;  %v1180_v18 = vld [vmem:[%s1250_s27 + $0x28] sm:$0xff]   ;;  %v645_v32 = vadd.s32 32, %v1283_v25  ;;  %v647_v36 = vadd.s32 48, %v1283_v25  ;;  %v646_v39 = vadd.s32 40, %v1283_v25 }
  0x11   : > { %1098 = vmatpush3.bf16.msra.mxu0 %v1168_v1  ;;  %1152 = vmatpush3.bf16.msra.mxu1 %v1168_v1  ;;  %v1186_v15 = vld [vmem:[%s1250_s27 + $0x58] sm:$0xff]   ;;  %v1187_v17 = vld [vmem:[%s1250_s27 + $0x60] sm:$0xff]   ;;  %v1188_v19 = vld [vmem:[%s1250_s27 + $0x68] sm:$0xff]   ;;  %v1292_v30 = vadd.s32 %v1287_v27, %v643_v26  ;;  %v1300_v33 = vadd.s32 %v1287_v27, %v642_v28  ;;  %v1308_v35 = vadd.s32 %v1287_v27, %v644_v29  ;;  %vm706_vm1 = vcmp.lt.s32.totalorder %v1296_v31, 512 }
  0x12   : > { %1099 = vmatprep.subr.bf16.mxu0 %v1169_v2  ;;  %1145 = vmatprep.subr.bf16.mxu1 %v1169_v2  ;;  %v1181_v20 = vld [vmem:[%s1250_s27 + $0x30] sm:$0xff]   ;;  %v1182_v22 = vld [vmem:[%s1250_s27 + $0x38] sm:$0xff]   ;;  %v1305_v34 = vld [vmem:[%s1661_s2] ss:$0 sm:$0xff]  ;;  %v1315_v38 = vadd.s32 %v1287_v27, %v645_v32  ;;  %v648_v42 = vadd.s32 56, %v1283_v25  ;;  %v1333_v45 = vadd.s32 %v1287_v27, %v647_v36  ;;  %v651_v46 = vadd.s32 80, %v1283_v25 }
  0x13   : > { %v1189_v21 = vld [vmem:[%s1250_s27 + $0x70] sm:$0xff]   ;;  %v1190_v23 = vld [vmem:[%s1250_s27 + $0x78] sm:$0xff]   ;;  %vm708_vm0 = vcmp.lt.s32.totalorder %v1292_v30, 512  ;;  %vm707_vm2 = vcmp.lt.s32.totalorder %v1300_v33, 512  ;;  %vm709_vm3 = vcmp.lt.s32.totalorder %v1308_v35, 512  ;;  %v649_v47 = vadd.s32 64, %v1283_v25 }
  0x14   : > { %v652_v48 = vadd.s32 88, %v1283_v25  ;;  %vm710_vm4 = vcmp.lt.s32.totalorder %v1315_v38, 512  ;;  %v1346_v55 = vadd.s32 %v1287_v27, %v646_v39  ;;  %v650_v56 = vadd.s32 72, %v1283_v25 }
  0x15   : > { %1100 = vmatpush3.bf16.msra.mxu0 %v1169_v2  ;;  %1153 = vmatpush3.bf16.msra.mxu1 %v1169_v2  ;;  %v655_v57 = vadd.s32 112, %v1283_v25  ;;  %v653_v58 = vadd.s32 96, %v1283_v25  ;;  %v1354_v62 = vadd.s32 %v1287_v27, %v648_v42  ;;  %v656_v63 = vadd.s32 120, %v1283_v25 }
  0x16   : > { %1101 = vmatprep.subr.bf16.mxu0 %v1170_v3  ;;  %1146 = vmatprep.subr.bf16.mxu1 %v1170_v3  ;;  %vm712_vm5 = vcmp.lt.s32.totalorder %v1333_v45, 512  ;;  %v1362_v1 = vadd.s32 %v1287_v27, %v651_v46  ;;  %v1365_v2 = vadd.s32 %v1287_v27, %v649_v47  ;;  %vm711_vm6 = vcmp.lt.s32.totalorder %v1346_v55, 512 }
  0x17   : > { %vm713_vm7 = vcmp.lt.s32.totalorder %v1354_v62, 512  ;;  %v657_v46 = vadd.s32 128, %v1283_v25 }
  0x18   : > { %vm714_vm8 = vcmp.lt.s32.totalorder %v1365_v2, 512  ;;  %vm716_vm9 = vcmp.lt.s32.totalorder %v1362_v1, 512 }
  0x19   : > { %1102 = vmatpush3.bf16.msra.mxu0 %v1170_v3  ;;  %1154 = vmatpush3.bf16.msra.mxu1 %v1170_v3  ;;  %v1480_v62 = vadd.s32 %v1287_v27, %v657_v46 }
  0x1a   : > { %1103 = vmatprep.subr.bf16.mxu0 %v1171_v5  ;;  %1147 = vmatprep.subr.bf16.mxu1 %v1171_v5 }
  0x1d   : > { %1104 = vmatpush3.bf16.msra.mxu0 %v1171_v5  ;;  %1155 = vmatpush3.bf16.msra.mxu1 %v1171_v5 }
  0x1e   : > { %1105 = vmatprep.subr.bf16.mxu0 %v1172_v6  ;;  %1148 = vmatprep.subr.bf16.mxu1 %v1172_v6 }
  0x21   : > { %1106 = vmatpush3.bf16.msra.mxu0 %v1172_v6  ;;  %1156 = vmatpush3.bf16.msra.mxu1 %v1172_v6 }
  0x22   : > { %1107 = vmatprep.subr.bf16.mxu0 %v1173_v8  ;;  %1149 = vmatprep.subr.bf16.mxu1 %v1173_v8 }
  0x25   : > { %1108 = vmatpush3.bf16.msra.mxu0 %v1173_v8  ;;  %1157 = vmatpush3.bf16.msra.mxu1 %v1173_v8  ;;  %v1374_v8 = vadd.s32 %v1287_v27, %v652_v48 }
  0x26   : > { %1109 = vmatprep.subr.bf16.mxu0 %v1174_v9  ;;  %1150 = vmatprep.subr.bf16.mxu1 %v1174_v9 }
  0x27   : > { %vm717_vm11 = vcmp.lt.s32.totalorder %v1374_v8, 512 }
  0x29   : > { %1110 = vmatpush3.bf16.msra.mxu0 %v1174_v9  ;;  %1158 = vmatpush3.bf16.msra.mxu1 %v1174_v9 }
  0x2c   : > { %1112 = vmatmul.mubr.bf16.vlgmr.msra.gmra.mxu0 %v1176_v10  ;;  %1128 = vmatmul.mubr.bf16.vlgmr.msra.gmra.mxu1 %v1184_v11  ;;  %v1381_v11 = vadd.s32 %v1287_v27, %v650_v56 }
  0x2d   : > { %1115 = vmatprep.mubr.bf16.mxu0 %v1177_v12  ;;  %1131 = vmatprep.mubr.bf16.mxu1 %v1185_v13  ;;  %v1384_v12 = vadd.s32 %v1287_v27, %v655_v57  ;;  %v1387_v13 = vadd.s32 %v1287_v27, %v653_v58  ;;  %v658_v58 = vadd.s32 136, %v1283_v25 }
  0x2e   : > { %vm715_vm10 = vcmp.lt.s32.totalorder %v1381_v11, 512 }
  0x2f   : > { %vm718_vm12 = vcmp.lt.s32.totalorder %v1387_v13, 512  ;;  %vm720_vm13 = vcmp.lt.s32.totalorder %v1384_v12, 512 }
  0x34   : > { %1116 = vmatmul.mubr.bf16.gmra.mxu0 %v1178_v14  ;;  %1132 = vmatmul.mubr.bf16.gmra.mxu1 %v1186_v15 }
  0x35   : > { %1119 = vmatprep.mubr.bf16.mxu0 %v1179_v16  ;;  %1135 = vmatprep.mubr.bf16.mxu1 %v1187_v17 }
  0x3c   : > { %1120 = vmatmul.mubr.bf16.gmra.mxu0 %v1180_v18  ;;  %1136 = vmatmul.mubr.bf16.gmra.mxu1 %v1188_v19  ;;  %v1398_v19 = vadd.s32 %v1287_v27, %v656_v63 }
  0x3d   : > { %1123 = vmatprep.mubr.bf16.mxu0 %v1181_v20  ;;  %1139 = vmatprep.mubr.bf16.mxu1 %v1189_v21  ;;  %v1402_v21 = vadd.s32 144, %v1283_v25 }
  0x3e   : > { %vm721_vm14 = vcmp.lt.s32.totalorder %v1398_v19, 512 }
  0x44   : > { %1124 = vmatmul.mubr.bf16.gmra.mxu0 %v1182_v22  ;;  %1140 = vmatmul.mubr.bf16.gmra.mxu1 %v1190_v23  ;;  %v654_v22 = vadd.s32 104, %v1283_v25 }
  0xec   : > { %v1113_v37 = vpop.f32.mrf.mxu0  ;;  %v1129_v40 = vpop.f32.mrf.mxu1 }
  0xed   : > { %v1319_v41 = vadd.f32 %v1113_v37, %v1305_v34  ;;  %v1324_v43 = vadd.f32 %v1129_v40, %v1305_v34 }
  0xee   : > { %v448_v44 = vpop.f32.mrf.mxu0  ;;  %v512_v49 = vpop.f32.mrf.mxu1 }
  0xef   : > { %v577_v50 = vmax.f32 %v1319_v41, 0.0  ;;  %v449_v51 = vadd.f32 %v1305_v34, %v448_v44  ;;  %v593_v52 = vmax.f32 %v1324_v43, 0.0  ;;  %v1342_v53 = vadd.f32 %v1305_v34, %v512_v49 }
  0xf0   : > { %v1114_v54 = vpop.f32.mrf.mxu0  ;;  %v1130_v59 = vpop.f32.mrf.mxu1 }
  0xf1   : > { %609 = vst [vmem:[%s1329_s20 + $0x10] sm:$0xff] %v577_v50  ;;  %v575_v60 = vmax.f32 %v449_v51, 0.0  ;;  %v460_v61 = vadd.f32 %v1114_v54, %v1305_v34  ;;  %625 = vst [vmem:[%s1329_s20 + $0x90] sm:$0xff] %v593_v52  ;;  %v591_v3 = vmax.f32 %v1342_v53, 0.0  ;;  %v1369_v4 = vadd.f32 %v1130_v59, %v1305_v34 }
  0xf2   : > { %v451_v0 = vpop.f32.mrf.mxu0  ;;  %v515_v5 = vpop.f32.mrf.mxu1  ;;  %v804_v28 = vsel %vm708_vm0, %v577_v50, 0.0  ;;  %v1430_v51 = vadd.s32 %v1287_v27, %v654_v22  ;;  %vm722_vm0 = vcmp.lt.s32.totalorder %v1480_v62, 512 }
  0xf3   : > { %607 = vst [vmem:[%s1329_s20] sm:$0xff] %v575_v60  ;;  %v578_v6 = vmax.f32 %v460_v61, 0.0  ;;  %v452_v7 = vadd.f32 %v1305_v34, %v451_v0  ;;  %v1377_v9 = vadd.f32 %v1305_v34, %v515_v5  ;;  %623 = vst [vmem:[%s1329_s20 + $0x80] sm:$0xff] %v591_v3  ;;  %v594_v14 = vmax.f32 %v1369_v4, 0.0 }
  0xf4   : > { %v1117_v10 = vpop.f32.mrf.mxu0  ;;  %v1133_v15 = vpop.f32.mrf.mxu1  ;;  %v802_v16 = vsel %vm706_vm1, %v575_v60, 0.0  ;;  %v873_v47 = vmul.f32 %v804_v28, %v804_v28  ;;  %vm719_vm15 = vcmp.lt.s32.totalorder %v1430_v51, 512  ;;  %v818_v19 = vsel %vm722_vm0, %v591_v3, 0.0 }
  0xf5   : > { %610 = vst [vmem:[%s1329_s20 + $0x18] sm:$0xff] %v578_v6  ;;  %v576_v17 = vmax.f32 %v452_v7, 0.0  ;;  %v473_v18 = vadd.f32 %v1117_v10, %v1305_v34  ;;  %626 = vst [vmem:[%s1329_s20 + $0x98] sm:$0xff] %v594_v14  ;;  %v592_v23 = vmax.f32 %v1377_v9, 0.0  ;;  %v1410_v24 = vadd.f32 %v1133_v15, %v1305_v34 }
  0xf6   : > { %v464_v20 = vpop.f32.mrf.mxu0  ;;  %v528_v26 = vpop.f32.mrf.mxu1  ;;  %v871_v36 = vmul.f32 %v802_v16, %v802_v16  ;;  %v805_v33 = vsel %vm709_vm3, %v578_v6, 0.0 }
  0xf7   : > { %608 = vst [vmem:[%s1329_s20 + $0x8] sm:$0xff] %v576_v17  ;;  %v803_v29 = vsel %vm707_vm2, %v576_v17, 0.0  ;;  %v581_v31 = vmax.f32 %v473_v18, 0.0  ;;  %v465_v32 = vadd.f32 %v1305_v34, %v464_v20  ;;  %624 = vst [vmem:[%s1329_s20 + $0x88] sm:$0xff] %v592_v23  ;;  %v597_v30 = vmax.f32 %v1410_v24, 0.0 }
  0xf8   : > { %v834_v37 = vadd.f32 %v803_v29, %v802_v16  ;;  %v872_v39 = vmul.f32 %v803_v29, %v803_v29  ;;  %v1118_v40 = vpop.f32.mrf.mxu0  ;;  %v1134_v41 = vpop.f32.mrf.mxu1  ;;  %v874_v59 = vmul.f32 %v805_v33, %v805_v33  ;;  %v1442_v0 = vadd.f32 %v1305_v34, %v528_v26 }
  0xf9   : > { %613 = vst [vmem:[%s1329_s20 + $0x30] sm:$0xff] %v581_v31  ;;  %v579_v42 = vmax.f32 %v465_v32, 0.0  ;;  %v476_v44 = vadd.f32 %v1118_v40, %v1305_v34  ;;  %629 = vst [vmem:[%s1329_s20 + $0xb0] sm:$0xff] %v597_v30  ;;  %v808_v38 = vsel %vm712_vm5, %v581_v31, 0.0  ;;  %v1449_v10 = vadd.f32 %v1134_v41, %v1305_v34 }
  0xfa   : > { %v835_v48 = vadd.f32 %v834_v37, %v804_v28  ;;  %v903_v49 = vadd.f32 %v872_v39, %v871_v36  ;;  %v467_v50 = vpop.f32.mrf.mxu0  ;;  %v531_v35 = vpop.f32.mrf.mxu1  ;;  %v595_v20 = vmax.f32 %v1442_v0, 0.0  ;;  %v660_v39 = vadd.s32 152, %v1283_v25 }
  0xfb   : > { %611 = vst [vmem:[%s1329_s20 + $0x20] sm:$0xff] %v579_v42  ;;  %v806_v54 = vsel %vm710_vm4, %v579_v42, 0.0  ;;  %v582_v56 = vmax.f32 %v476_v44, 0.0  ;;  %v468_v57 = vadd.f32 %v1305_v34, %v467_v50  ;;  %v598_v29 = vmax.f32 %v1449_v10, 0.0 }
  0xfc   : > { %v904_v60 = vadd.f32 %v903_v49, %v873_v47  ;;  %v836_v61 = vadd.f32 %v835_v48, %v805_v33  ;;  %v1121_v63 = vpop.f32.mrf.mxu0  ;;  %v1137_v5 = vpop.f32.mrf.mxu1  ;;  %v875_v16 = vmul.f32 %v806_v54, %v806_v54  ;;  %627 = vst [vmem:[%s1329_s20 + $0xa0] sm:$0xff] %v595_v20  ;;  %v1473_v42 = vadd.s32 %v1287_v27, %v1402_v21 }
  0xfd   : > { %614 = vst [vmem:[%s1329_s20 + $0x38] sm:$0xff] %v582_v56  ;;  %v580_v6 = vmax.f32 %v468_v57, 0.0  ;;  %v489_v7 = vadd.f32 %v1121_v63, %v1305_v34  ;;  %v809_v40 = vsel %vm713_vm7, %v582_v56, 0.0  ;;  %630 = vst [vmem:[%s1329_s20 + $0xb8] sm:$0xff] %v598_v29  ;;  %v877_v44 = vmul.f32 %v808_v38, %v808_v38 }
  0xfe   : > { %v837_v15 = vadd.f32 %v836_v61, %v806_v54  ;;  %v905_v17 = vadd.f32 %v904_v60, %v874_v59  ;;  %v480_v18 = vpop.f32.mrf.mxu0  ;;  %v1453_v22 = vpop.f32.mrf.mxu1  ;;  %v1487_v57 = vadd.s32 %v1287_v27, %v658_v58  ;;  %v878_v59 = vmul.f32 %v809_v40, %v809_v40 }
  0xff   : > { %612 = vst [vmem:[%s1329_s20 + $0x28] sm:$0xff] %v580_v6  ;;  %v807_v45 = vsel %vm711_vm6, %v580_v6, 0.0  ;;  %v585_v26 = vmax.f32 %v489_v7, 0.0  ;;  %v481_v28 = vadd.f32 %v1305_v34, %v480_v18  ;;  %vm724_vm2 = vcmp.lt.s32.totalorder %v1473_v42, 512 }
 0x100   : > { %v906_v31 = vadd.f32 %v905_v17, %v875_v16  ;;  %v838_v32 = vadd.f32 %v837_v15, %v807_v45  ;;  %v876_v36 = vmul.f32 %v807_v45, %v807_v45  ;;  %v1122_v37 = vpop.f32.mrf.mxu0  ;;  %v1465_v55 = vpop.f32.mrf.mxu1  ;;  %v1497_v15 = vadd.f32 %v1137_v5, %v1305_v34 }
 0x101   : > { %617 = vst [vmem:[%s1329_s20 + $0x50] sm:$0xff] %v585_v26  ;;  %v583_v41 = vmax.f32 %v481_v28, 0.0  ;;  %v492_v33 = vadd.f32 %v1122_v37, %v1305_v34  ;;  %v812_v6 = vsel %vm716_vm9, %v585_v26, 0.0  ;;  %vm723_vm1 = vcmp.lt.s32.totalorder %v1487_v57, 512 }
 0x102   : > { %v839_v47 = vadd.f32 %v838_v32, %v808_v38  ;;  %v907_v48 = vadd.f32 %v906_v31, %v876_v36  ;;  %v483_v49 = vpop.f32.mrf.mxu0  ;;  %v547_v50 = vpop.f32.mrf.mxu1  ;;  %v1490_v38 = vadd.f32 %v1305_v34, %v531_v35  ;;  %v601_v5 = vmax.f32 %v1497_v15, 0.0 }
 0x103   : > { %615 = vst [vmem:[%s1329_s20 + $0x40] sm:$0xff] %v583_v41  ;;  %v810_v54 = vsel %vm714_vm8, %v583_v41, 0.0  ;;  %v586_v21 = vmax.f32 %v492_v33, 0.0  ;;  %v484_v56 = vadd.f32 %v1305_v34, %v483_v49  ;;  %v1515_v33 = vadd.s32 %v1287_v27, %v660_v39 }
 0x104   : > { %v908_v60 = vadd.f32 %v907_v48, %v877_v44  ;;  %v840_v61 = vadd.f32 %v839_v47, %v809_v40  ;;  %v1125_v63 = vpop.f32.mrf.mxu0  ;;  %v1141_v46 = vpop.f32.mrf.mxu1  ;;  %v879_v16 = vmul.f32 %v810_v54, %v810_v54  ;;  %v596_v35 = vmax.f32 %v1490_v38, 0.0  ;;  %633 = vst [vmem:[%s1329_s20 + $0xd0] sm:$0xff] %v601_v5 }
 0x105   : > { %618 = vst [vmem:[%s1329_s20 + $0x58] sm:$0xff] %v586_v21  ;;  %v584_v2 = vmax.f32 %v484_v56, 0.0  ;;  %v505_v7 = vadd.f32 %v1125_v63, %v1305_v34  ;;  %v813_v11 = vsel %vm717_vm11, %v586_v21, 0.0  ;;  %v881_v44 = vmul.f32 %v812_v6, %v812_v6 }
 0x106   : > { %v841_v58 = vadd.f32 %v840_v61, %v810_v54  ;;  %v909_v17 = vadd.f32 %v908_v60, %v878_v59  ;;  %v496_v18 = vpop.f32.mrf.mxu0  ;;  %628 = vst [vmem:[%s1329_s20 + $0xa8] sm:$0xff] %v596_v35  ;;  %v560_v37 = vpop.f32.mrf.mxu1  ;;  %v882_v39 = vmul.f32 %v813_v11, %v813_v11  ;;  %v1529_v60 = vadd.f32 %v1305_v34, %v1453_v22 }
 0x107   : > { %616 = vst [vmem:[%s1329_s20 + $0x48] sm:$0xff] %v584_v2  ;;  %v811_v1 = vsel %vm715_vm10, %v584_v2, 0.0  ;;  %v589_v45 = vmax.f32 %v505_v7, 0.0  ;;  %v497_v26 = vadd.f32 %v1305_v34, %v496_v18  ;;  %v1539_v2 = vadd.f32 %v1305_v34, %v547_v50 }
 0x108   : > { %v910_v28 = vadd.f32 %v909_v17, %v879_v16  ;;  %v842_v31 = vadd.f32 %v841_v58, %v811_v1  ;;  %v880_v32 = vmul.f32 %v811_v1, %v811_v1  ;;  %v1126_v36 = vpop.f32.mrf.mxu0  ;;  %v1142_v61 = vpop.f32.mrf.mxu1  ;;  %vm725_vm3 = vcmp.lt.s32.totalorder %v1515_v33, 512 }
 0x109   : > { %621 = vst [vmem:[%s1329_s20 + $0x70] sm:$0xff] %v589_v45  ;;  %v587_v40 = vmax.f32 %v497_v26, 0.0  ;;  %v508_v41 = vadd.f32 %v1126_v36, %v1305_v34  ;;  %v816_v13 = vsel %vm720_vm13, %v589_v45, 0.0  ;;  %v599_v22 = vmax.f32 %v1529_v60, 0.0 }
 0x10a   : > { %v843_v47 = vadd.f32 %v842_v31, %v812_v6  ;;  %v911_v48 = vadd.f32 %v910_v28, %v880_v32  ;;  %v499_v49 = vpop.f32.mrf.mxu0  ;;  %v1536_v6 = vadd.f32 %v1465_v55, %v1305_v34  ;;  %v600_v17 = vmax.f32 %v1539_v2, 0.0  ;;  %v563_v28 = vpop.f32.mrf.mxu1 }
 0x10b   : > { %619 = vst [vmem:[%s1329_s20 + $0x60] sm:$0xff] %v587_v40  ;;  %v814_v8 = vsel %vm718_vm12, %v587_v40, 0.0  ;;  %v590_v54 = vmax.f32 %v508_v41, 0.0  ;;  %v500_v21 = vadd.f32 %v1305_v34, %v499_v49  ;;  %v1549_v50 = vadd.f32 %v1141_v46, %v1305_v34  ;;  %631 = vst [vmem:[%s1329_s20 + $0xc0] sm:$0xff] %v599_v22 }
 0x10c   : > { %v912_v56 = vadd.f32 %v911_v48, %v881_v44  ;;  %v844_v59 = vadd.f32 %v843_v47, %v813_v11  ;;  %v883_v58 = vmul.f32 %v814_v8, %v814_v8  ;;  %v602_v55 = vmax.f32 %v1536_v6, 0.0  ;;  %632 = vst [vmem:[%s1329_s20 + $0xc8] sm:$0xff] %v600_v17 }
 0x10d   : > { %622 = vst [vmem:[%s1329_s20 + $0x78] sm:$0xff] %v590_v54  ;;  %v588_v63 = vmax.f32 %v500_v21, 0.0  ;;  %v661_v26 = vadd.s32 160, %v1283_v25  ;;  %v817_v51 = vsel %vm721_vm14, %v590_v54, 0.0  ;;  %v663_v31 = vadd.s32 176, %v1283_v25 }
 0x10e   : > { %v845_v7 = vadd.f32 %v844_v59, %v814_v8  ;;  %v913_v16 = vadd.f32 %v912_v56, %v882_v39  ;;  %v664_v32 = vadd.s32 184, %v1283_v25  ;;  %634 = vst [vmem:[%s1329_s20 + $0xd8] sm:$0xff] %v602_v55  ;;  %v605_v46 = vmax.f32 %v1549_v50, 0.0 }
 0x10f   : > { %620 = vst [vmem:[%s1329_s20 + $0x68] sm:$0xff] %v588_v63  ;;  %v815_v12 = vsel %vm719_vm15, %v588_v63, 0.0  ;;  %v885_v36 = vmul.f32 %v816_v13, %v816_v13  ;;  %v662_v41 = vadd.s32 168, %v1283_v25  ;;  %v1575_v44 = vadd.f32 %v1305_v34, %v560_v37 }
 0x110   : > { %v914_v18 = vadd.f32 %v913_v16, %v883_v58  ;;  %v846_v1 = vadd.f32 %v845_v7, %v815_v12  ;;  %v884_v45 = vmul.f32 %v815_v12, %v815_v12  ;;  %637 = vst [vmem:[%s1329_s20 + $0xf0] sm:$0xff] %v605_v46  ;;  %v1578_v47 = vadd.f32 %v1142_v61, %v1305_v34 }
 0x111   : > { %v1581_v48 = vadd.f32 %v1305_v34, %v563_v28  ;;  %v886_v49 = vmul.f32 %v817_v51, %v817_v51  ;;  %v694_v3 = vadd.s32 %v1287_v27, %v661_v26  ;;  %v819_v62 = vsel %vm723_vm1, %v592_v23, 0.0 }
 0x112   : > { %v847_v11 = vadd.f32 %v846_v1, %v816_v13  ;;  %v915_v40 = vadd.f32 %v914_v18, %v884_v45  ;;  %v603_v37 = vmax.f32 %v1575_v44, 0.0  ;;  %v606_v54 = vmax.f32 %v1578_v47, 0.0 }
 0x113   : > { %v604_v34 = vmax.f32 %v1581_v48, 0.0  ;;  %v887_v21 = vmul.f32 %v818_v19, %v818_v19  ;;  %v695_v59 = vadd.s32 %v1287_v27, %v662_v41  ;;  %v820_v61 = vsel %vm724_vm2, %v593_v52, 0.0 }
 0x114   : > { %v916_v8 = vadd.f32 %v915_v40, %v885_v36  ;;  %v848_v53 = vadd.f32 %v847_v11, %v817_v51  ;;  %v696_v9 = vadd.s32 %v1287_v27, %v663_v31  ;;  %v665_v23 = vadd.s32 192, %v1283_v25  ;;  %635 = vst [vmem:[%s1329_s20 + $0xe0] sm:$0xff] %v603_v37  ;;  %638 = vst [vmem:[%s1329_s20 + $0xf8] sm:$0xff] %v606_v54 }
 0x115   : > { %636 = vst [vmem:[%s1329_s20 + $0xe8] sm:$0xff] %v604_v34  ;;  %v888_v13 = vmul.f32 %v819_v62, %v819_v62  ;;  %vm726_vm4 = vcmp.lt.s32.totalorder %v694_v3, 512  ;;  %v821_v43 = vsel %vm725_vm3, %v594_v14, 0.0  ;;  %v697_v52 = vadd.s32 %v1287_v27, %v664_v32 }
 0x116   : > { %v849_v39 = vadd.f32 %v848_v53, %v818_v19  ;;  %v917_v56 = vadd.f32 %v916_v8, %v886_v49  ;;  %v666_v42 = vadd.s32 200, %v1283_v25  ;;  %v889_v7 = vmul.f32 %v820_v61, %v820_v61 }
 0x117   : > { %vm727_vm5 = vcmp.lt.s32.totalorder %v695_v59, 512  ;;  %v822_v12 = vsel %vm726_vm4, %v595_v20, 0.0  ;;  %v667_v18 = vadd.s32 208, %v1283_v25  ;;  %v698_v1 = vadd.s32 %v1287_v27, %v665_v23 }
 0x118   : > { %v850_v57 = vadd.f32 %v849_v39, %v819_v62  ;;  %v918_v63 = vadd.f32 %v917_v56, %v887_v21  ;;  %v890_v45 = vmul.f32 %v821_v43, %v821_v43  ;;  %vm728_vm6 = vcmp.lt.s32.totalorder %v696_v9, 512 }
 0x119   : > { %v823_v14 = vsel %vm727_vm5, %v596_v35, 0.0  ;;  %v668_v26 = vadd.s32 216, %v1283_v25  ;;  %v699_v28 = vadd.s32 %v1287_v27, %v666_v42  ;;  %v891_v31 = vmul.f32 %v822_v12, %v822_v12 }
 0x11a   : > { %v851_v58 = vadd.f32 %v850_v57, %v820_v61  ;;  %v919_v16 = vadd.f32 %v918_v63, %v888_v13  ;;  %vm729_vm7 = vcmp.lt.s32.totalorder %v697_v52, 512  ;;  %v824_v0 = vsel %vm728_vm6, %v597_v30, 0.0 }
 0x11b   : > { %v700_v20 = vadd.s32 %v1287_v27, %v667_v18  ;;  %vm730_vm8 = vcmp.lt.s32.totalorder %v698_v1, 512  ;;  %v892_v40 = vmul.f32 %v823_v14, %v823_v14  ;;  %v669_v38 = vadd.s32 224, %v1283_v25 }
 0x11c   : > { %v920_v4 = vadd.f32 %v919_v16, %v889_v7  ;;  %v852_v33 = vadd.f32 %v851_v58, %v821_v43  ;;  %v825_v35 = vsel %vm729_vm7, %v598_v29, 0.0  ;;  %v701_v41 = vadd.s32 %v1287_v27, %v668_v26 }
 0x11d   : > { %vm731_vm9 = vcmp.lt.s32.totalorder %v699_v28, 512  ;;  %v893_v19 = vmul.f32 %v824_v0, %v824_v0  ;;  %v670_v24 = vadd.s32 232, %v1283_v25  ;;  %vm732_vm10 = vcmp.lt.s32.totalorder %v700_v20, 512 }
 0x11e   : > { %v853_v51 = vadd.f32 %v852_v33, %v822_v12  ;;  %v921_v32 = vadd.f32 %v920_v4, %v890_v45  ;;  %v826_v30 = vsel %vm730_vm8, %v599_v22, 0.0  ;;  %v671_v53 = vadd.s32 240, %v1283_v25 }
 0x11f   : > { %v894_v3 = vmul.f32 %v825_v35, %v825_v35  ;;  %v702_v10 = vadd.s32 %v1287_v27, %v669_v38  ;;  %vm733_vm11 = vcmp.lt.s32.totalorder %v701_v41, 512  ;;  %v827_v29 = vsel %vm731_vm9, %v600_v17, 0.0 }
 0x120   : > { %v922_v36 = vadd.f32 %v921_v32, %v891_v31  ;;  %v854_v11 = vadd.f32 %v853_v51, %v823_v14  ;;  %v672_v39 = vadd.s32 248, %v1283_v25  ;;  %v895_v59 = vmul.f32 %v826_v30, %v826_v30 }
 0x121   : > { %v703_v9 = vadd.s32 %v1287_v27, %v670_v24  ;;  %v828_v60 = vsel %vm732_vm10, %v601_v5, 0.0  ;;  %v704_v22 = vadd.s32 %v1287_v27, %v671_v53  ;;  %v896_v13 = vmul.f32 %v827_v29, %v827_v29 }
 0x122   : > { %v855_v49 = vadd.f32 %v854_v11, %v824_v0  ;;  %v923_v8 = vadd.f32 %v922_v36, %v892_v40  ;;  %vm734_vm12 = vcmp.lt.s32.totalorder %v702_v10, 512  ;;  %v829_v2 = vsel %vm733_vm11, %v602_v55, 0.0 }
 0x123   : > { %v705_v17 = vadd.s32 %v1287_v27, %v672_v39  ;;  %v897_v25 = vmul.f32 %v828_v60, %v828_v60  ;;  %vm735_vm13 = vcmp.lt.s32.totalorder %v703_v9, 512  ;;  %v830_v52 = vsel %vm734_vm12, %v603_v37, 0.0 }
 0x124   : > { %v924_v62 = vadd.f32 %v923_v8, %v893_v19  ;;  %v856_v21 = vadd.f32 %v855_v49, %v825_v35  ;;  %v898_v15 = vmul.f32 %v829_v2, %v829_v2  ;;  %vm736_vm14 = vcmp.lt.s32.totalorder %v704_v22, 512 }
 0x125   : > { %v831_v7 = vsel %vm735_vm13, %v604_v34, 0.0  ;;  %v899_v6 = vmul.f32 %v830_v52, %v830_v52  ;;  %vm737_vm15 = vcmp.lt.s32.totalorder %v705_v17, 512  ;;  %v832_v27 = vsel %vm736_vm14, %v605_v46, 0.0 }
 0x126   : > { %v857_v56 = vadd.f32 %v856_v21, %v826_v30  ;;  %v925_v61 = vadd.f32 %v924_v62, %v894_v3  ;;  %v900_v44 = vmul.f32 %v831_v7, %v831_v7  ;;  %v833_v37 = vsel %vm737_vm15, %v606_v54, 0.0 }
 0x127   : > { %v901_v18 = vmul.f32 %v832_v27, %v832_v27  ;;  %v902_v4 = vmul.f32 %v833_v37, %v833_v37 }
 0x128   : > { %v926_v23 = vadd.f32 %v925_v61, %v895_v59  ;;  %v858_v57 = vadd.f32 %v857_v56, %v827_v29 }
 0x12a   : > { %v859_v63 = vadd.f32 %v858_v57, %v828_v60  ;;  %v927_v43 = vadd.f32 %v926_v23, %v896_v13 }
 0x12c   : > { %v928_v5 = vadd.f32 %v927_v43, %v897_v25  ;;  %v860_v42 = vadd.f32 %v859_v63, %v829_v2 }
 0x12e   : > { %v861_v58 = vadd.f32 %v860_v42, %v830_v52  ;;  %v929_v55 = vadd.f32 %v928_v5, %v898_v15 }
 0x130   : > { %v930_v16 = vadd.f32 %v929_v55, %v899_v6  ;;  %v862_v12 = vadd.f32 %v861_v58, %v831_v7 }
 0x132   : > { %v863_v1 = vadd.f32 %v862_v12, %v832_v27  ;;  %v931_v45 = vadd.f32 %v930_v16, %v900_v44 }
 0x134   : > { %v864_v48 = vadd.f32 %v863_v1, %v833_v37  ;;  %v932_v34 = vadd.f32 %v931_v45, %v901_v18 }
 0x136   : > { %v865_v33 = vrot.slane %v864_v48, 4  ;;  %v933_v14 = vadd.f32 %v932_v34, %v902_v4 }
 0x138   : > { %v866_v26 = vadd.f32 %v865_v33, %v864_v48  ;;  %v934_v28 = vrot.slane %v933_v14, 4 }
 0x13a   : > { %v867_v50 = vrot.slane %v866_v26, 2  ;;  %v935_v46 = vadd.f32 %v934_v28, %v933_v14 }
 0x13c   : > { %v868_v51 = vadd.f32 %v867_v50, %v866_v26  ;;  %v936_v31 = vrot.slane %v935_v46, 2 }
 0x13e   : > { %v869_v32 = vrot.slane %v868_v51, 1  ;;  %v937_v47 = vadd.f32 %v936_v31, %v935_v46 }
 0x140   : > { %v870_v54 = vadd.f32 %v869_v32, %v868_v51  ;;  %v938_v0 = vrot.slane %v937_v47, 1 }
 0x142   : > { %v939_v20 = vadd.f32 %v938_v0, %v937_v47  ;;  %940 = vst [vmem:[%s213_s24] sm:$0xff] %v870_v54 }
 0x144   : > { %941 = vst [vmem:[%s213_s24 + $0x8] sm:$0xff] %v939_v20 }
 0x145 PF: > { %s15_s15 = sadd.s32 1, %s1197_s15  }
 0x146   : > { %p12_p5 = scmp.ge.s32.totalorder %s15_s15, 4  }
 0x148   :  { %14 = sbr.rel (!%p12_p5) target bundleno = 1 (0x1), region = 74 }

// kernel: bottleneck_forward.6
= control target key start
LH: loop header
LB: loop body
LE: loop exit
PB: predicated region body
PF: predicated region fallthrough
CT: control target
= control target key end

     0   :  { %s1356_s18 = smov 0   ;;  %s1854_s0 = inlined_call_operand.vmem [shape: bf16[512,128], index: 0, kind: input, shape index: {}]   ;;  %s1855_s1 = inlined_call_operand.vmem [shape: bf16[128,128], index: 1, kind: input, shape index: {}]   ;;  %s1856_s2 = inlined_call_operand.vmem [shape: f32[1,128], index: 2, kind: input, shape index: {}]   ;;  %s1857_s3 = inlined_call_operand.vmem [shape: f32[512,128], index: 3, kind: input, shape index: {}]   ;;  %s1858_s4 = inlined_call_operand.vmem [shape: f32[512,128], index: 4, kind: output, shape index: {0}]   ;;  %s1859_s5 = inlined_call_operand.vmem [shape: f32[16,256], index: 5, kind: output, shape index: {1}]  }
   0x1 LB: > { %s1362_s19 = sadd.s32 4294967295, %s1324_s18   ;;  %p1160_p0 = scmp.ge.s32.totalorder %s1324_s18, 1  ;;  %s1324_s18 = sphi %s1356_s18, %s16_s18  }
   0x2   : > { %p202_p1 = scmp.lt.s32.totalorder %s1324_s18, 3 }
   0x4   : > { %p203_p2 = pnand %p1160_p0, %p202_p1 }
   0x5   : > { %s1161_s22 = sshll.u32 (!%p203_p2), %s1362_s19, 5  ;;  %s1194_s16 = sshll.u32 (!%p203_p2), %s1362_s19, 8 }
   0x6   : > { %206 = sbr.rel (%p203_p2) target bundleno = 327 (0x147), region = 36  ;;  %p241_p3 = scmp.lt.s32.totalorder (!%p203_p2), %s1161_s22, 63 }
   0x7   : > { %p258_p4 = scmp.lt.s32.totalorder (!%p203_p2), %s1362_s19, 1 }
   0xb   : > { %v1294_v0 = vld [vmem:[%s1855_s1 + $0x38] sm:$0xff]   ;;  %v1295_v1 = vld [vmem:[%s1855_s1 + $0x30] sm:$0xff]   ;;  %s1861_s22 = smov (!%p241_p3, %s1161_s22), 63  ;;  %v1296_v2 = vld [vmem:[%s1855_s1 + $0x28] sm:$0xff]   ;;  %v753_v24 = vlaneseq  ;;  %v1420_v27 = vstv %s1194_s16  ;;  %s1863_s19 = smov (!%p258_p4, %s1362_s19), 1 }
   0xc   : > { %1222 = vmatprep.subr.bf16.mxu0 %v1294_v0  ;;  %1270 = vmatprep.subr.bf16.mxu1 %v1294_v0  ;;  %s1162_s27 = sshll.u32 %s1861_s22, 2  ;;  %v1297_v3 = vld [vmem:[%s1855_s1 + $0x20] sm:$0xff]   ;;  %v1298_v5 = vld [vmem:[%s1855_s1 + $0x18] sm:$0xff]   ;;  %v1299_v6 = vld [vmem:[%s1855_s1 + $0x10] sm:$0xff]   ;;  %s1164_s17 = sshll.u32 %s1861_s22, 3 }
   0xd   : > { %1223 = vmatpush3.bf16.msra.mxu0 %v1294_v0  ;;  %1278 = vmatpush3.bf16.msra.mxu1 %v1294_v0  ;;  %s1382_s30 = scalar_lea.vmem %s1854_s0, %s1162_s27  ;;  %v1300_v8 = vld [vmem:[%s1855_s1 + $0x8] sm:$0xff]   ;;  %v1301_v9 = vld [vmem:[%s1855_s1] sm:$0xff]   ;;  %v1415_v25 = vshrl.u32 %v753_v24, 7  ;;  %s1438_s23 = scalar_lea.vmem %s1857_s3, %s1164_s17 }
   0xe   : > { %1224 = vmatprep.subr.bf16.mxu0 %v1295_v1  ;;  %1271 = vmatprep.subr.bf16.mxu1 %v1295_v1  ;;  %v1302_v4 = vld [vmem:[%s1382_s30] sm:$0xff]   ;;  %v1303_v10 = vld [vmem:[%s1382_s30 + $0x8] sm:$0xff]   ;;  %v1304_v12 = vld [vmem:[%s1382_s30 + $0x10] sm:$0xff]   ;;  %s1507_s28 = scalar_lea.vmem %s1858_s4, %s1164_s17  ;;  %s1197_s22 = sshll.u32 %s1863_s19, 4 }
   0xf   : > { %1238 = vmatprep.mubr.bf16.mxu0 %v1302_v4  ;;  %v1310_v7 = vld [vmem:[%s1382_s30 + $0x40] sm:$0xff]   ;;  %v1311_v11 = vld [vmem:[%s1382_s30 + $0x48] sm:$0xff]   ;;  %v1312_v13 = vld [vmem:[%s1382_s30 + $0x50] sm:$0xff]   ;;  %v756_v26 = vadd.s32 16, %v1415_v25  ;;  %v755_v28 = vadd.s32 8, %v1415_v25  ;;  %v757_v29 = vadd.s32 24, %v1415_v25  ;;  %v1429_v33 = vadd.s32 %v1420_v27, %v1415_v25  ;;  %s262_s6 = scalar_lea.vmem %s1859_s5, %s1197_s22 }
  0x10   : > { %1254 = vmatprep.mubr.bf16.mxu1 %v1310_v7  ;;  %v1305_v14 = vld [vmem:[%s1382_s30 + $0x18] sm:$0xff]   ;;  %v1306_v16 = vld [vmem:[%s1382_s30 + $0x20] sm:$0xff]   ;;  %v1307_v18 = vld [vmem:[%s1382_s30 + $0x28] sm:$0xff]   ;;  %v760_v30 = vadd.s32 48, %v1415_v25  ;;  %v758_v31 = vadd.s32 32, %v1415_v25  ;;  %v761_v32 = vadd.s32 56, %v1415_v25 }
  0x11   : > { %1225 = vmatpush3.bf16.msra.mxu0 %v1295_v1  ;;  %1279 = vmatpush3.bf16.msra.mxu1 %v1295_v1  ;;  %v1313_v15 = vld [vmem:[%s1382_s30 + $0x58] sm:$0xff]   ;;  %v1314_v17 = vld [vmem:[%s1382_s30 + $0x60] sm:$0xff]   ;;  %v1315_v19 = vld [vmem:[%s1382_s30 + $0x68] sm:$0xff]   ;;  %v759_v34 = vadd.s32 40, %v1415_v25  ;;  %v764_v35 = vadd.s32 80, %v1415_v25  ;;  %v1441_v36 = vadd.s32 %v1420_v27, %v756_v26  ;;  %v762_v37 = vadd.s32 64, %v1415_v25 }
  0x12   : > { %1226 = vmatprep.subr.bf16.mxu0 %v1296_v2  ;;  %1272 = vmatprep.subr.bf16.mxu1 %v1296_v2  ;;  %v1308_v20 = vld [vmem:[%s1382_s30 + $0x30] sm:$0xff]   ;;  %v1309_v22 = vld [vmem:[%s1382_s30 + $0x38] sm:$0xff]   ;;  %v765_v38 = vadd.s32 88, %v1415_v25  ;;  %v1448_v39 = vld [vmem:[%s1856_s2] ss:$0 sm:$0xff]  ;;  %v1451_v40 = vadd.s32 %v1420_v27, %v755_v28  ;;  %v763_v41 = vadd.s32 72, %v1415_v25  ;;  %v1456_v43 = vadd.s32 %v1420_v27, %v757_v29 }
  0x13   : > { %v1316_v21 = vld [vmem:[%s1382_s30 + $0x70] sm:$0xff]   ;;  %v1317_v23 = vld [vmem:[%s1382_s30 + $0x78] sm:$0xff]   ;;  %v768_v42 = vadd.s32 112, %v1415_v25  ;;  %v1459_v44 = vadd.s32 %v1420_v27, %v760_v30  ;;  %v1462_v45 = vadd.s32 %v1420_v27, %v758_v31  ;;  %v1465_v46 = vadd.s32 %v1420_v27, %v761_v32  ;;  %v624_v60 = vld [vmem:[%s1438_s23] sm:$0xff] }
  0x14   : > { %v626_v48 = vld [vmem:[%s1438_s23 + $0x10] sm:$0xff]  ;;  %vm819_vm0 = vcmp.lt.s32.totalorder %v1429_v33, 512  ;;  %v1470_v49 = vadd.s32 %v1420_v27, %v759_v34  ;;  %v1473_v50 = vadd.s32 %v1420_v27, %v764_v35  ;;  %v766_v51 = vadd.s32 96, %v1415_v25 }
  0x15   : > { %1227 = vmatpush3.bf16.msra.mxu0 %v1296_v2  ;;  %1280 = vmatpush3.bf16.msra.mxu1 %v1296_v2  ;;  %v642_v53 = vld [vmem:[%s1438_s23 + $0x90] sm:$0xff]  ;;  %v769_v54 = vadd.s32 120, %v1415_v25  ;;  %vm821_vm1 = vcmp.lt.s32.totalorder %v1441_v36, 512  ;;  %v1481_v56 = vadd.s32 %v1420_v27, %v762_v37  ;;  %v1484_v57 = vadd.s32 %v1420_v27, %v765_v38 }
  0x16   : > { %1228 = vmatprep.subr.bf16.mxu0 %v1297_v3  ;;  %1273 = vmatprep.subr.bf16.mxu1 %v1297_v3  ;;  %vm820_vm2 = vcmp.lt.s32.totalorder %v1451_v40, 512  ;;  %v1490_v61 = vadd.s32 %v1420_v27, %v763_v41  ;;  %v1493_v62 = vadd.s32 %v1420_v27, %v768_v42  ;;  %v772_v63 = vadd.s32 144, %v1415_v25  ;;  %v630_v34 = vld [vmem:[%s1438_s23 + $0x30] sm:$0xff] }
  0x17   : > { %v767_v1 = vadd.s32 104, %v1415_v25  ;;  %vm822_vm3 = vcmp.lt.s32.totalorder %v1456_v43, 512  ;;  %vm823_vm4 = vcmp.lt.s32.totalorder %v1462_v45, 512  ;;  %v771_v26 = vadd.s32 136, %v1415_v25 }
  0x18   : > { %v1537_v31 = vadd.s32 %v1420_v27, %v772_v63  ;;  %v776_v42 = vadd.s32 176, %v1415_v25  ;;  %vm825_vm5 = vcmp.lt.s32.totalorder %v1459_v44, 512  ;;  %vm824_vm6 = vcmp.lt.s32.totalorder %v1470_v49, 512 }
  0x19   : > { %1229 = vmatpush3.bf16.msra.mxu0 %v1297_v3  ;;  %1281 = vmatpush3.bf16.msra.mxu1 %v1297_v3  ;;  %v777_v63 = vadd.s32 184, %v1415_v25  ;;  %vm826_vm7 = vcmp.lt.s32.totalorder %v1465_v46, 512  ;;  %vm827_vm8 = vcmp.lt.s32.totalorder %v1481_v56, 512  ;;  %vm829_vm9 = vcmp.lt.s32.totalorder %v1473_v50, 512 }
  0x1a   : > { %1230 = vmatprep.subr.bf16.mxu0 %v1298_v5  ;;  %1274 = vmatprep.subr.bf16.mxu1 %v1298_v5  ;;  %vm828_vm10 = vcmp.lt.s32.totalorder %v1490_v61, 512  ;;  %vm830_vm11 = vcmp.lt.s32.totalorder %v1484_v57, 512  ;;  %vm833_vm13 = vcmp.lt.s32.totalorder %v1493_v62, 512  ;;  %vm837_vm15 = vcmp.lt.s32.totalorder %v1537_v31, 512 }
  0x1d   : > { %1231 = vmatpush3.bf16.msra.mxu0 %v1298_v5  ;;  %1282 = vmatpush3.bf16.msra.mxu1 %v1298_v5 }
  0x1e   : > { %1232 = vmatprep.subr.bf16.mxu0 %v1299_v6  ;;  %1275 = vmatprep.subr.bf16.mxu1 %v1299_v6 }
  0x21   : > { %1233 = vmatpush3.bf16.msra.mxu0 %v1299_v6  ;;  %1283 = vmatpush3.bf16.msra.mxu1 %v1299_v6  ;;  %v640_v6 = vld [vmem:[%s1438_s23 + $0x80] sm:$0xff] }
  0x22   : > { %1234 = vmatprep.subr.bf16.mxu0 %v1300_v8  ;;  %1276 = vmatprep.subr.bf16.mxu1 %v1300_v8 }
  0x25   : > { %1235 = vmatpush3.bf16.msra.mxu0 %v1300_v8  ;;  %1284 = vmatpush3.bf16.msra.mxu1 %v1300_v8  ;;  %v627_v8 = vld [vmem:[%s1438_s23 + $0x18] sm:$0xff] }
  0x26   : > { %1236 = vmatprep.subr.bf16.mxu0 %v1301_v9  ;;  %1277 = vmatprep.subr.bf16.mxu1 %v1301_v9 }
  0x29   : > { %1237 = vmatpush3.bf16.msra.mxu0 %v1301_v9  ;;  %1285 = vmatpush3.bf16.msra.mxu1 %v1301_v9  ;;  %v1512_v9 = vadd.s32 %v1420_v27, %v766_v51 }
  0x2b   : > { %vm831_vm12 = vcmp.lt.s32.totalorder %v1512_v9, 512 }
  0x2c   : > { %1239 = vmatmul.mubr.bf16.vlgmr.msra.gmra.mxu0 %v1303_v10  ;;  %1255 = vmatmul.mubr.bf16.vlgmr.msra.gmra.mxu1 %v1311_v11  ;;  %v1515_v10 = vadd.s32 %v1420_v27, %v769_v54  ;;  %v770_v11 = vadd.s32 128, %v1415_v25  ;;  %v628_v54 = vld [vmem:[%s1438_s23 + $0x20] sm:$0xff] }
  0x2d   : > { %1242 = vmatprep.mubr.bf16.mxu0 %v1304_v12  ;;  %1258 = vmatprep.mubr.bf16.mxu1 %v1312_v13  ;;  %v773_v13 = vadd.s32 152, %v1415_v25 }
  0x2e   : > { %v1542_v37 = vadd.s32 %v1420_v27, %v770_v11  ;;  %v1582_v11 = vadd.s32 %v1420_v27, %v776_v42 }
  0x34   : > { %1243 = vmatmul.mubr.bf16.gmra.mxu0 %v1305_v14  ;;  %1259 = vmatmul.mubr.bf16.gmra.mxu1 %v1313_v15 }
  0x35   : > { %1246 = vmatprep.mubr.bf16.mxu0 %v1306_v16  ;;  %1262 = vmatprep.mubr.bf16.mxu1 %v1314_v17 }
  0x3c   : > { %1247 = vmatmul.mubr.bf16.gmra.mxu0 %v1307_v18  ;;  %1263 = vmatmul.mubr.bf16.gmra.mxu1 %v1315_v19  ;;  %v643_v18 = vld [vmem:[%s1438_s23 + $0x98] sm:$0xff] }
  0x3d   : > { %1250 = vmatprep.mubr.bf16.mxu0 %v1308_v20  ;;  %1266 = vmatprep.mubr.bf16.mxu1 %v1316_v21  ;;  %v625_v20 = vld [vmem:[%s1438_s23 + $0x8] sm:$0xff] }
  0x44   : > { %1251 = vmatmul.mubr.bf16.gmra.mxu0 %v1309_v22  ;;  %1267 = vmatmul.mubr.bf16.gmra.mxu1 %v1317_v23  ;;  %v1527_v22 = vadd.s32 %v1420_v27, %v767_v1 }
  0x46   : > { %vm832_vm14 = vcmp.lt.s32.totalorder %v1527_v22, 512  ;;  %v1722_v22 = vadd.s32 200, %v1415_v25 }
  0xec   : > { %v1240_v47 = vpop.f32.mrf.mxu0  ;;  %v1256_v52 = vpop.f32.mrf.mxu1 }
  0xed   : > { %v506_v55 = vadd.f32 %v1240_v47, %v1448_v39  ;;  %v570_v58 = vadd.f32 %v1256_v52, %v1448_v39  ;;  %v1553_v52 = vadd.s32 %v1420_v27, %v773_v13  ;;  %v1587_v13 = vadd.s32 168, %v1415_v25 }
  0xee   : > { %v497_v59 = vpop.f32.mrf.mxu0  ;;  %v561_v0 = vpop.f32.mrf.mxu1 }
  0xef   : > { %v658_v2 = vadd.f32 %v626_v48, %v506_v55  ;;  %v498_v3 = vadd.f32 %v1448_v39, %v497_v59  ;;  %v1498_v4 = vadd.f32 %v642_v53, %v570_v58  ;;  %v562_v5 = vadd.f32 %v1448_v39, %v561_v0 }
  0xf0   : > { %v1241_v7 = vpop.f32.mrf.mxu0  ;;  %v1257_v12 = vpop.f32.mrf.mxu1  ;;  %v1562_v58 = vadd.s32 %v1420_v27, %v771_v26 }
  0xf1   : > { %v690_v14 = vmax.f32 %v658_v2, 0.0  ;;  %v656_v15 = vadd.f32 %v624_v60, %v498_v3  ;;  %v509_v16 = vadd.f32 %v1241_v7, %v1448_v39  ;;  %v706_v17 = vmax.f32 %v1498_v4, 0.0 }
  0xf2   : > { %v500_v19 = vpop.f32.mrf.mxu0  ;;  %v1524_v21 = vadd.f32 %v640_v6, %v562_v5  ;;  %v573_v23 = vadd.f32 %v1257_v12, %v1448_v39  ;;  %v564_v24 = vpop.f32.mrf.mxu1  ;;  %v774_v60 = vadd.s32 160, %v1415_v25  ;;  %v641_v5 = vld [vmem:[%s1438_s23 + $0x88] sm:$0xff] }
  0xf3   : > { %722 = vst [vmem:[%s1507_s28 + $0x10] sm:$0xff] %v690_v14  ;;  %v688_v28 = vmax.f32 %v656_v15, 0.0  ;;  %v659_v29 = vadd.f32 %v627_v8, %v509_v16  ;;  %v501_v30 = vadd.f32 %v1448_v39, %v500_v19  ;;  %738 = vst [vmem:[%s1507_s28 + $0x90] sm:$0xff] %v706_v17  ;;  %v917_v6 = vsel %vm821_vm1, %v690_v14, 0.0  ;;  %v631_v8 = vld [vmem:[%s1438_s23 + $0x38] sm:$0xff] }
  0xf4   : > { %v1244_v32 = vpop.f32.mrf.mxu0  ;;  %v704_v35 = vmax.f32 %v1524_v21, 0.0  ;;  %v1544_v38 = vadd.f32 %v643_v18, %v573_v23  ;;  %v1546_v41 = vpop.f32.mrf.mxu1  ;;  %v565_v33 = vadd.f32 %v1448_v39, %v564_v24  ;;  %v629_v24 = vld [vmem:[%s1438_s23 + $0x28] sm:$0xff]  ;;  %v1616_v45 = vadd.s32 %v1420_v27, %v774_v60 }
  0xf5   : > { %720 = vst [vmem:[%s1507_s28] sm:$0xff] %v688_v28  ;;  %v691_v47 = vmax.f32 %v659_v29, 0.0  ;;  %v657_v48 = vadd.f32 %v625_v20, %v501_v30  ;;  %v522_v51 = vadd.f32 %v1244_v32, %v1448_v39  ;;  %v915_v0 = vsel %vm819_vm0, %v688_v28, 0.0 }
  0xf6   : > { %v513_v53 = vpop.f32.mrf.mxu0  ;;  %736 = vst [vmem:[%s1507_s28 + $0x80] sm:$0xff] %v704_v35  ;;  %v707_v55 = vmax.f32 %v1544_v38, 0.0  ;;  %v1564_v59 = vpop.f32.mrf.mxu1  ;;  %v984_v18 = vmul.f32 %v915_v0, %v915_v0  ;;  %v1595_v26 = vadd.f32 %v641_v5, %v565_v33  ;;  %vm834_vm0 = vcmp.lt.s32.totalorder %v1515_v10, 512  ;;  %v651_v10 = vld [vmem:[%s1438_s23 + $0xd8] sm:$0xff] }
  0xf7   : > { %723 = vst [vmem:[%s1507_s28 + $0x18] sm:$0xff] %v691_v47  ;;  %v689_v1 = vmax.f32 %v657_v48, 0.0  ;;  %v662_v2 = vadd.f32 %v630_v34, %v522_v51  ;;  %v514_v3 = vadd.f32 %v1448_v39, %v513_v53  ;;  %v918_v40 = vsel %vm822_vm3, %v691_v47, 0.0  ;;  %v634_v53 = vld [vmem:[%s1438_s23 + $0x50] sm:$0xff] }
  0xf8   : > { %v1245_v7 = vpop.f32.mrf.mxu0  ;;  %739 = vst [vmem:[%s1507_s28 + $0x98] sm:$0xff] %v707_v55  ;;  %v1584_v12 = vpop.f32.mrf.mxu1  ;;  %v986_v34 = vmul.f32 %v917_v6, %v917_v6  ;;  %vm835_vm1 = vcmp.lt.s32.totalorder %v1542_v37, 512  ;;  %vm838_vm3 = vcmp.lt.s32.totalorder %v1553_v52, 512  ;;  %v654_v37 = vld [vmem:[%s1438_s23 + $0xf0] sm:$0xff]  ;;  %v653_v52 = vld [vmem:[%s1438_s23 + $0xe8] sm:$0xff] }
  0xf9   : > { %721 = vst [vmem:[%s1507_s28 + $0x8] sm:$0xff] %v689_v1  ;;  %v916_v36 = vsel %vm820_vm2, %v689_v1, 0.0  ;;  %v694_v14 = vmax.f32 %v662_v2, 0.0  ;;  %v660_v15 = vadd.f32 %v628_v54, %v514_v3  ;;  %v525_v16 = vadd.f32 %v1245_v7, %v1448_v39  ;;  %v632_v7 = vld [vmem:[%s1438_s23 + $0x40] sm:$0xff] }
  0xfa   : > { %v947_v19 = vadd.f32 %v916_v36, %v915_v0  ;;  %v985_v20 = vmul.f32 %v916_v36, %v916_v36  ;;  %v516_v23 = vpop.f32.mrf.mxu0  ;;  %v1597_v28 = vpop.f32.mrf.mxu1  ;;  %v705_v54 = vmax.f32 %v1595_v26, 0.0  ;;  %v987_v2 = vmul.f32 %v918_v40, %v918_v40 }
  0xfb   : > { %726 = vst [vmem:[%s1507_s28 + $0x30] sm:$0xff] %v694_v14  ;;  %v692_v29 = vmax.f32 %v660_v15, 0.0  ;;  %v663_v30 = vadd.f32 %v631_v8, %v525_v16  ;;  %v517_v32 = vadd.f32 %v1448_v39, %v516_v23  ;;  %v1623_v16 = vadd.s32 %v1420_v27, %v777_v63 }
  0xfc   : > { %v948_v42 = vadd.f32 %v947_v19, %v917_v6  ;;  %v1016_v48 = vadd.f32 %v985_v20, %v984_v18  ;;  %v1248_v51 = vpop.f32.mrf.mxu0  ;;  %737 = vst [vmem:[%s1507_s28 + $0x88] sm:$0xff] %v705_v54  ;;  %v1618_v8 = vpop.f32.mrf.mxu1  ;;  %v921_v18 = vsel %vm825_vm5, %v694_v14, 0.0  ;;  %vm836_vm2 = vcmp.lt.s32.totalorder %v1562_v58, 512 }
  0xfd   : > { %724 = vst [vmem:[%s1507_s28 + $0x20] sm:$0xff] %v692_v29  ;;  %v919_v43 = vsel %vm823_vm4, %v692_v29, 0.0  ;;  %v695_v47 = vmax.f32 %v663_v30, 0.0  ;;  %v661_v0 = vadd.f32 %v629_v24, %v517_v32  ;;  %v538_v1 = vadd.f32 %v1248_v51, %v1448_v39  ;;  %v635_v24 = vld [vmem:[%s1438_s23 + $0x58] sm:$0xff]  ;;  %v646_v32 = vld [vmem:[%s1438_s23 + $0xb0] sm:$0xff] }
  0xfe   : > { %v1017_v3 = vadd.f32 %v1016_v48, %v986_v34  ;;  %v949_v5 = vadd.f32 %v948_v42, %v918_v40  ;;  %v529_v6 = vpop.f32.mrf.mxu0  ;;  %v988_v20 = vmul.f32 %v919_v43, %v919_v43  ;;  %v633_v48 = vld [vmem:[%s1438_s23 + $0x48] sm:$0xff]  ;;  %v586_v51 = vadd.f32 %v1546_v41, %v1448_v39 }
  0xff   : > { %727 = vst [vmem:[%s1507_s28 + $0x38] sm:$0xff] %v695_v47  ;;  %v693_v33 = vmax.f32 %v661_v0, 0.0  ;;  %v666_v36 = vadd.f32 %v634_v53, %v538_v1  ;;  %v530_v15 = vadd.f32 %v1448_v39, %v529_v6  ;;  %v1638_v53 = vpop.f32.mrf.mxu1  ;;  %v922_v49 = vsel %vm826_vm7, %v695_v47, 0.0 }
 0x100   : > { %v950_v19 = vadd.f32 %v949_v5, %v919_v43  ;;  %v1018_v23 = vadd.f32 %v1017_v3, %v987_v2  ;;  %v1249_v60 = vpop.f32.mrf.mxu0  ;;  %v990_v2 = vmul.f32 %v921_v18, %v921_v18  ;;  %v1646_v41 = vadd.f32 %v646_v32, %v586_v51 }
 0x101   : > { %725 = vst [vmem:[%s1507_s28 + $0x28] sm:$0xff] %v693_v33  ;;  %v920_v40 = vsel %vm824_vm6, %v693_v33, 0.0  ;;  %v698_v29 = vmax.f32 %v666_v36, 0.0  ;;  %v664_v30 = vadd.f32 %v632_v7, %v530_v15  ;;  %v541_v63 = vadd.f32 %v1249_v60, %v1448_v39  ;;  %v638_v7 = vld [vmem:[%s1438_s23 + $0x70] sm:$0xff] }
 0x102   : > { %v1019_v44 = vadd.f32 %v1018_v23, %v988_v20  ;;  %v951_v14 = vadd.f32 %v950_v19, %v920_v40  ;;  %v989_v34 = vmul.f32 %v920_v40, %v920_v40  ;;  %v532_v42 = vpop.f32.mrf.mxu0  ;;  %v991_v15 = vmul.f32 %v922_v49, %v922_v49  ;;  %v636_v23 = vld [vmem:[%s1438_s23 + $0x60] sm:$0xff] }
 0x103   : > { %730 = vst [vmem:[%s1507_s28 + $0x50] sm:$0xff] %v698_v29  ;;  %v696_v43 = vmax.f32 %v664_v30, 0.0  ;;  %v667_v0 = vadd.f32 %v635_v24, %v541_v63  ;;  %v533_v1 = vadd.f32 %v1448_v39, %v532_v42  ;;  %v710_v60 = vmax.f32 %v1646_v41, 0.0  ;;  %v1655_v24 = vpop.f32.mrf.mxu1 }
 0x104   : > { %v952_v3 = vadd.f32 %v951_v14, %v921_v18  ;;  %v1020_v5 = vadd.f32 %v1019_v44, %v989_v34  ;;  %v1252_v6 = vpop.f32.mrf.mxu0  ;;  %v1661_v63 = vadd.s32 %v1420_v27, %v1587_v13  ;;  %v925_v32 = vsel %vm829_vm9, %v698_v29, 0.0 }
 0x105   : > { %728 = vst [vmem:[%s1507_s28 + $0x40] sm:$0xff] %v696_v43  ;;  %v923_v46 = vsel %vm827_vm8, %v696_v43, 0.0  ;;  %v699_v47 = vmax.f32 %v667_v0, 0.0  ;;  %v665_v33 = vadd.f32 %v633_v48, %v533_v1  ;;  %v554_v36 = vadd.f32 %v1252_v6, %v1448_v39  ;;  %v639_v48 = vld [vmem:[%s1438_s23 + $0x78] sm:$0xff]  ;;  %742 = vst [vmem:[%s1507_s28 + $0xb0] sm:$0xff] %v710_v60 }
 0x106   : > { %v1021_v19 = vadd.f32 %v1020_v5, %v990_v2  ;;  %v953_v20 = vadd.f32 %v952_v3, %v922_v49  ;;  %v545_v18 = vpop.f32.mrf.mxu0  ;;  %v992_v14 = vmul.f32 %v923_v46, %v923_v46  ;;  %v637_v2 = vld [vmem:[%s1438_s23 + $0x68] sm:$0xff]  ;;  %v1678_v3 = vadd.s32 192, %v1415_v25  ;;  %v1680_v5 = vpop.f32.mrf.mxu1 }
 0x107   : > { %731 = vst [vmem:[%s1507_s28 + $0x58] sm:$0xff] %v699_v47  ;;  %v697_v56 = vmax.f32 %v665_v33, 0.0  ;;  %v670_v40 = vadd.f32 %v638_v7, %v554_v36  ;;  %v546_v30 = vadd.f32 %v1448_v39, %v545_v18  ;;  %v926_v61 = vsel %vm830_vm11, %v699_v47, 0.0  ;;  %v644_v33 = vld [vmem:[%s1438_s23 + $0xa0] sm:$0xff]  ;;  %v647_v18 = vld [vmem:[%s1438_s23 + $0xb8] sm:$0xff] }
 0x108   : > { %v954_v44 = vadd.f32 %v953_v20, %v923_v46  ;;  %v1022_v34 = vadd.f32 %v1021_v19, %v991_v15  ;;  %v1253_v42 = vpop.f32.mrf.mxu0  ;;  %v994_v36 = vmul.f32 %v925_v32, %v925_v32  ;;  %v578_v20 = vadd.f32 %v1448_v39, %v1564_v59 }
 0x109   : > { %729 = vst [vmem:[%s1507_s28 + $0x48] sm:$0xff] %v697_v56  ;;  %v924_v13 = vsel %vm828_vm10, %v697_v56, 0.0  ;;  %v702_v50 = vmax.f32 %v670_v40, 0.0  ;;  %v668_v29 = vadd.f32 %v636_v23, %v546_v30  ;;  %v557_v51 = vadd.f32 %v1253_v42, %v1448_v39 }
 0x10a   : > { %v1023_v49 = vadd.f32 %v1022_v34, %v992_v14  ;;  %v955_v43 = vadd.f32 %v954_v44, %v924_v13  ;;  %v993_v0 = vmul.f32 %v924_v13, %v924_v13  ;;  %v548_v1 = vpop.f32.mrf.mxu0  ;;  %v589_v56 = vadd.f32 %v1584_v12, %v1448_v39  ;;  %v645_v14 = vld [vmem:[%s1438_s23 + $0xa8] sm:$0xff]  ;;  %v1268_v34 = vpop.f32.mrf.mxu1 }
 0x10b   : > { %734 = vst [vmem:[%s1507_s28 + $0x70] sm:$0xff] %v702_v50  ;;  %v700_v6 = vmax.f32 %v668_v29, 0.0  ;;  %v671_v7 = vadd.f32 %v639_v48, %v557_v51  ;;  %v549_v46 = vadd.f32 %v1448_v39, %v548_v1  ;;  %v995_v40 = vmul.f32 %v926_v61, %v926_v61 }
 0x10c   : > { %v956_v15 = vadd.f32 %v955_v43, %v925_v32  ;;  %v1024_v19 = vadd.f32 %v1023_v49, %v993_v0  ;;  %v1696_v44 = vadd.f32 %v644_v33, %v578_v20  ;;  %v929_v59 = vsel %vm833_vm13, %v702_v50, 0.0  ;;  %v650_v49 = vld [vmem:[%s1438_s23 + $0xd0] sm:$0xff]  ;;  %v648_v33 = vld [vmem:[%s1438_s23 + $0xc0] sm:$0xff] }
 0x10d   : > { %732 = vst [vmem:[%s1507_s28 + $0x60] sm:$0xff] %v700_v6  ;;  %v927_v57 = vsel %vm831_vm12, %v700_v6, 0.0  ;;  %v703_v47 = vmax.f32 %v671_v7, 0.0  ;;  %v669_v23 = vadd.f32 %v637_v2, %v549_v46  ;;  %v1702_v42 = vadd.f32 %v647_v18, %v589_v56 }
 0x10e   : > { %v1025_v30 = vadd.f32 %v1024_v19, %v994_v36  ;;  %v957_v32 = vadd.f32 %v956_v15, %v926_v61  ;;  %v581_v12 = vadd.f32 %v1448_v39, %v1597_v28  ;;  %v996_v13 = vmul.f32 %v927_v57, %v927_v57  ;;  %v609_v61 = vpop.f32.mrf.mxu1 }
 0x10f   : > { %735 = vst [vmem:[%s1507_s28 + $0x78] sm:$0xff] %v703_v47  ;;  %v701_v9 = vmax.f32 %v669_v23, 0.0  ;;  %v708_v51 = vmax.f32 %v1696_v44, 0.0  ;;  %v711_v50 = vmax.f32 %v1702_v42, 0.0  ;;  %v602_v28 = vadd.f32 %v1618_v8, %v1448_v39 }
 0x110   : > { %v958_v48 = vadd.f32 %v957_v32, %v927_v57  ;;  %v1026_v29 = vadd.f32 %v1025_v30, %v995_v40  ;;  %v1713_v43 = vadd.f32 %v645_v14, %v581_v12  ;;  %vm839_vm4 = vcmp.lt.s32.totalorder %v1616_v45, 512 }
 0x111   : > { %733 = vst [vmem:[%s1507_s28 + $0x68] sm:$0xff] %v701_v9  ;;  %v928_v62 = vsel %vm832_vm14, %v701_v9, 0.0  ;;  %740 = vst [vmem:[%s1507_s28 + $0xa0] sm:$0xff] %v708_v51  ;;  %v933_v8 = vsel %vm837_vm15, %v706_v17, 0.0  ;;  %v930_v6 = vsel %vm834_vm0, %v703_v47, 0.0  ;;  %v1734_v46 = vadd.f32 %v650_v49, %v602_v28  ;;  %v649_v17 = vld [vmem:[%s1438_s23 + $0xc8] sm:$0xff] }
 0x112   : > { %v1027_v0 = vadd.f32 %v1026_v29, %v996_v13  ;;  %v959_v1 = vadd.f32 %v958_v48, %v928_v62  ;;  %v997_v2 = vmul.f32 %v928_v62, %v928_v62  ;;  %743 = vst [vmem:[%s1507_s28 + $0xb8] sm:$0xff] %v711_v50  ;;  %v709_v7 = vmax.f32 %v1713_v43, 0.0  ;;  %v655_v49 = vld [vmem:[%s1438_s23 + $0xf8] sm:$0xff] }
 0x113   : > { %v998_v36 = vmul.f32 %v929_v59, %v929_v59  ;;  %vm840_vm5 = vcmp.lt.s32.totalorder %v1661_v63, 512  ;;  %v594_v4 = vadd.f32 %v1448_v39, %v1638_v53  ;;  %v931_v31 = vsel %vm835_vm1, %v704_v35, 0.0  ;;  %v1269_v35 = vpop.f32.mrf.mxu1 }
 0x114   : > { %v960_v15 = vadd.f32 %v959_v1, %v929_v59  ;;  %v1028_v19 = vadd.f32 %v1027_v0, %v997_v2  ;;  %741 = vst [vmem:[%s1507_s28 + $0xa8] sm:$0xff] %v709_v7  ;;  %v714_v20 = vmax.f32 %v1734_v46, 0.0  ;;  %v605_v18 = vadd.f32 %v1655_v24, %v1448_v39 }
 0x115   : > { %v597_v57 = vadd.f32 %v1448_v39, %v1680_v5  ;;  %v999_v53 = vmul.f32 %v930_v6, %v930_v6  ;;  %vm841_vm6 = vcmp.lt.s32.totalorder %v1582_v11, 512  ;;  %v1755_v21 = vadd.f32 %v648_v33, %v594_v4  ;;  %v612_v62 = vpop.f32.mrf.mxu1 }
 0x116   : > { %v1029_v47 = vadd.f32 %v1028_v19, %v998_v36  ;;  %v961_v23 = vadd.f32 %v960_v15, %v930_v6  ;;  %v932_v56 = vsel %vm836_vm2, %v705_v54, 0.0  ;;  %746 = vst [vmem:[%s1507_s28 + $0xd0] sm:$0xff] %v714_v20  ;;  %v1765_v24 = vadd.f32 %v651_v10, %v605_v18 }
 0x117   : > { %v1767_v5 = vadd.f32 %v649_v17, %v597_v57  ;;  %v618_v40 = vadd.f32 %v1268_v34, %v1448_v39  ;;  %v1000_v30 = vmul.f32 %v931_v31, %v931_v31  ;;  %v712_v26 = vmax.f32 %v1755_v21, 0.0  ;;  %v652_v34 = vld [vmem:[%s1438_s23 + $0xe0] sm:$0xff] }
 0x118   : > { %v962_v32 = vadd.f32 %v961_v23, %v931_v31  ;;  %v1030_v14 = vadd.f32 %v1029_v47, %v999_v53  ;;  %v715_v58 = vmax.f32 %v1765_v24, 0.0  ;;  %v610_v9 = vadd.f32 %v1448_v39, %v609_v61 }
 0x119   : > { %v713_v54 = vmax.f32 %v1767_v5, 0.0  ;;  %v1773_v59 = vadd.f32 %v654_v37, %v618_v40  ;;  %v1001_v48 = vmul.f32 %v932_v56, %v932_v56  ;;  %744 = vst [vmem:[%s1507_s28 + $0xc0] sm:$0xff] %v712_v26  ;;  %v621_v29 = vadd.f32 %v1269_v35, %v1448_v39 }
 0x11a   : > { %v963_v12 = vadd.f32 %v962_v32, %v932_v56  ;;  %v1031_v13 = vadd.f32 %v1030_v14, %v1000_v30  ;;  %v934_v28 = vsel %vm838_vm3, %v707_v55, 0.0  ;;  %v780_v0 = vadd.s32 208, %v1415_v25  ;;  %747 = vst [vmem:[%s1507_s28 + $0xd8] sm:$0xff] %v715_v58 }
 0x11b   : > { %v781_v1 = vadd.s32 216, %v1415_v25  ;;  %745 = vst [vmem:[%s1507_s28 + $0xc8] sm:$0xff] %v713_v54  ;;  %v718_v2 = vmax.f32 %v1773_v59, 0.0  ;;  %v1002_v61 = vmul.f32 %v933_v8, %v933_v8  ;;  %v811_v38 = vadd.s32 %v1420_v27, %v1678_v3 }
 0x11c   : > { %v964_v6 = vadd.f32 %v963_v12, %v933_v8  ;;  %v1032_v33 = vadd.f32 %v1031_v13, %v1001_v48  ;;  %v935_v55 = vsel %vm839_vm4, %v708_v51, 0.0  ;;  %v684_v36 = vadd.f32 %v652_v34, %v610_v9 }
 0x11d   : > { %750 = vst [vmem:[%s1507_s28 + $0xf0] sm:$0xff] %v718_v2  ;;  %v1803_v15 = vadd.f32 %v655_v49, %v621_v29  ;;  %v613_v19 = vadd.f32 %v1448_v39, %v612_v62  ;;  %v1003_v8 = vmul.f32 %v934_v28, %v934_v28  ;;  %v812_v3 = vadd.s32 %v1420_v27, %v1722_v22 }
 0x11e   : > { %v1033_v4 = vadd.f32 %v1032_v33, %v1002_v61  ;;  %v965_v10 = vadd.f32 %v964_v6, %v934_v28  ;;  %v936_v45 = vsel %vm840_vm5, %v709_v7, 0.0  ;;  %v716_v44 = vmax.f32 %v684_v36, 0.0 }
 0x11f   : > { %v719_v51 = vmax.f32 %v1803_v15, 0.0  ;;  %v685_v17 = vadd.f32 %v653_v52, %v613_v19  ;;  %v1004_v18 = vmul.f32 %v935_v55, %v935_v55  ;;  %vm842_vm7 = vcmp.lt.s32.totalorder %v1623_v16, 512 }
 0x120   : > { %v966_v31 = vadd.f32 %v965_v10, %v935_v55  ;;  %v1034_v39 = vadd.f32 %v1033_v4, %v1003_v8  ;;  %v937_v22 = vsel %vm841_vm6, %v710_v60, 0.0  ;;  %v813_v43 = vadd.s32 %v1420_v27, %v780_v0  ;;  %748 = vst [vmem:[%s1507_s28 + $0xe0] sm:$0xff] %v716_v44 }
 0x121   : > { %vm843_vm8 = vcmp.lt.s32.totalorder %v811_v38, 512  ;;  %751 = vst [vmem:[%s1507_s28 + $0xf8] sm:$0xff] %v719_v51  ;;  %v717_v63 = vmax.f32 %v685_v17, 0.0  ;;  %v1005_v53 = vmul.f32 %v936_v45, %v936_v45  ;;  %v782_v47 = vadd.s32 224, %v1415_v25 }
 0x122   : > { %v1035_v7 = vadd.f32 %v1034_v39, %v1004_v18  ;;  %v967_v57 = vadd.f32 %v966_v31, %v936_v45  ;;  %v938_v16 = vsel %vm842_vm7, %v711_v50, 0.0  ;;  %v814_v41 = vadd.s32 %v1420_v27, %v781_v1 }
 0x123   : > { %vm844_vm9 = vcmp.lt.s32.totalorder %v812_v3, 512  ;;  %749 = vst [vmem:[%s1507_s28 + $0xe8] sm:$0xff] %v717_v63  ;;  %v1006_v11 = vmul.f32 %v937_v22, %v937_v22  ;;  %v783_v21 = vadd.s32 232, %v1415_v25  ;;  %vm845_vm10 = vcmp.lt.s32.totalorder %v813_v43, 512 }
 0x124   : > { %v968_v60 = vadd.f32 %v967_v57, %v937_v22  ;;  %v1036_v23 = vadd.f32 %v1035_v7, %v1005_v53  ;;  %v939_v37 = vsel %vm843_vm8, %v712_v26, 0.0  ;;  %v784_v35 = vadd.s32 240, %v1415_v25 }
 0x125   : > { %v1007_v56 = vmul.f32 %v938_v16, %v938_v16  ;;  %v815_v42 = vadd.s32 %v1420_v27, %v782_v47  ;;  %vm846_vm11 = vcmp.lt.s32.totalorder %v814_v41, 512  ;;  %v940_v50 = vsel %vm844_vm9, %v713_v54, 0.0 }
 0x126   : > { %v1037_v40 = vadd.f32 %v1036_v23, %v1006_v11  ;;  %v969_v30 = vadd.f32 %v968_v60, %v938_v16  ;;  %v785_v32 = vadd.s32 248, %v1415_v25  ;;  %v1008_v9 = vmul.f32 %v939_v37, %v939_v37 }
 0x127   : > { %v816_v48 = vadd.s32 %v1420_v27, %v783_v21  ;;  %v941_v26 = vsel %vm845_vm10, %v714_v20, 0.0  ;;  %v817_v13 = vadd.s32 %v1420_v27, %v784_v35  ;;  %v1009_v49 = vmul.f32 %v940_v50, %v940_v50 }
 0x128   : > { %v970_v14 = vadd.f32 %v969_v30, %v939_v37  ;;  %v1038_v12 = vadd.f32 %v1037_v40, %v1007_v56  ;;  %vm847_vm12 = vcmp.lt.s32.totalorder %v815_v42, 512  ;;  %v942_v5 = vsel %vm846_vm11, %v715_v58, 0.0 }
 0x129   : > { %v818_v54 = vadd.s32 %v1420_v27, %v785_v32  ;;  %v1010_v25 = vmul.f32 %v941_v26, %v941_v26  ;;  %vm848_vm13 = vcmp.lt.s32.totalorder %v816_v48, 512  ;;  %v943_v0 = vsel %vm847_vm12, %v716_v44, 0.0 }
 0x12a   : > { %v1039_v34 = vadd.f32 %v1038_v12, %v1008_v9  ;;  %v971_v29 = vadd.f32 %v970_v14, %v940_v50  ;;  %v1011_v1 = vmul.f32 %v942_v5, %v942_v5  ;;  %vm849_vm14 = vcmp.lt.s32.totalorder %v817_v13, 512 }
 0x12b   : > { %v944_v20 = vsel %vm848_vm13, %v717_v63, 0.0  ;;  %v1012_v33 = vmul.f32 %v943_v0, %v943_v0  ;;  %vm850_vm15 = vcmp.lt.s32.totalorder %v818_v54, 512  ;;  %v945_v24 = vsel %vm849_vm14, %v718_v2, 0.0 }
 0x12c   : > { %v972_v62 = vadd.f32 %v971_v29, %v941_v26  ;;  %v1040_v28 = vadd.f32 %v1039_v34, %v1009_v49  ;;  %v1013_v52 = vmul.f32 %v944_v20, %v944_v20  ;;  %v946_v55 = vsel %vm850_vm15, %v719_v51, 0.0 }
 0x12d   : > { %v1014_v36 = vmul.f32 %v945_v24, %v945_v24  ;;  %v1015_v4 = vmul.f32 %v946_v55, %v946_v55 }
 0x12e   : > { %v1041_v61 = vadd.f32 %v1040_v28, %v1010_v25  ;;  %v973_v46 = vadd.f32 %v972_v62, %v942_v5 }
 0x130   : > { %v974_v6 = vadd.f32 %v973_v46, %v943_v0  ;;  %v1042_v38 = vadd.f32 %v1041_v61, %v1011_v1 }
 0x132   : > { %v1043_v27 = vadd.f32 %v1042_v38, %v1012_v33  ;;  %v975_v58 = vadd.f32 %v974_v6, %v944_v20 }
 0x134   : > { %v976_v19 = vadd.f32 %v975_v58, %v945_v24  ;;  %v1044_v8 = vadd.f32 %v1043_v27, %v1013_v52 }
 0x136   : > { %v977_v10 = vadd.f32 %v976_v19, %v946_v55  ;;  %v1045_v3 = vadd.f32 %v1044_v8, %v1014_v36 }
 0x138   : > { %v978_v45 = vrot.slane %v977_v10, 4  ;;  %v1046_v44 = vadd.f32 %v1045_v3, %v1015_v4 }
 0x13a   : > { %v979_v17 = vadd.f32 %v978_v45, %v977_v10  ;;  %v1047_v31 = vrot.slane %v1046_v44, 4 }
 0x13c   : > { %v980_v59 = vrot.slane %v979_v17, 2  ;;  %v1048_v2 = vadd.f32 %v1047_v31, %v1046_v44 }
 0x13e   : > { %v981_v18 = vadd.f32 %v980_v59, %v979_v17  ;;  %v1049_v39 = vrot.slane %v1048_v2, 2 }
 0x140   : > { %v982_v22 = vrot.slane %v981_v18, 1  ;;  %v1050_v15 = vadd.f32 %v1049_v39, %v1048_v2 }
 0x142   : > { %v983_v51 = vadd.f32 %v982_v22, %v981_v18  ;;  %v1051_v43 = vrot.slane %v1050_v15, 1 }
 0x144   : > { %v1052_v63 = vadd.f32 %v1051_v43, %v1050_v15  ;;  %1053 = vst [vmem:[%s262_s6] sm:$0xff] %v983_v51 }
 0x146   : > { %1054 = vst [vmem:[%s262_s6 + $0x8] sm:$0xff] %v1052_v63 }
 0x147 PF: > { %s16_s18 = sadd.s32 1, %s1324_s18  }
 0x148   : > { %p13_p5 = scmp.ge.s32.totalorder %s16_s18, 4  }
 0x14a   :  { %15 = sbr.rel (!%p13_p5) target bundleno = 1 (0x1), region = 81 }

// kernel: bottleneck_forward.7
= control target key start
LH: loop header
LB: loop body
LE: loop exit
PB: predicated region body
PF: predicated region fallthrough
CT: control target
= control target key end

     0   :  { %s1254_s12 = smov 0   ;;  %s1690_s0 = inlined_call_operand.vmem [shape: bf16[512,128], index: 0, kind: input, shape index: {}]   ;;  %s1691_s1 = inlined_call_operand.vmem [shape: bf16[128,512], index: 1, kind: input, shape index: {}]   ;;  %s1692_s2 = inlined_call_operand.vmem [shape: f32[1,512], index: 2, kind: input, shape index: {}]   ;;  %s1693_s3 = inlined_call_operand.vmem [shape: f32[512,512], index: 3, kind: output, shape index: {}]  }
   0x1 LB: > { %s1091_s13 = sadd.s32 4294967295, %s1231_s12   ;;  %p1095_p0 = scmp.ge.s32.totalorder %s1231_s12, 1  ;;  %s1231_s12 = sphi %s1254_s12, %s13_s12  }
   0x2   : > { %p138_p1 = scmp.lt.s32.totalorder %s1231_s12, 3 }
   0x4   : > { %p139_p2 = pnand %p1095_p0, %p138_p1 }
   0x5   : > { %s1096_s5 = sshll.u32 (!%p139_p2), %s1091_s13, 5 }
   0x6   : > { %142 = sbr.rel (%p139_p2) target bundleno = 367 (0x16f), region = 32  ;;  %p164_p3 = scmp.lt.s32.totalorder (!%p139_p2), %s1096_s5, 63 }
   0xb   : > { %v1161_v0 = vld [vmem:[%s1691_s1 + $0xe4] ss:$16 sps:$4 sm:$0xff]   ;;  %v1163_v1 = vld [vmem:[%s1691_s1 + $0xec] ss:$16 sps:$4 sm:$0xff]   ;;  %v1233_v2 = vmov 0   ;;  %s1695_s5 = smov (!%p164_p3, %s1096_s5), 63  ;;  %v243_v49 = vlaneseq }
   0xc   : > { %551 = vmatprep.mubr.bf16.mxu0 %v1233_v2  ;;  %744 = vmatprep.mubr.bf16.mxu1 %v1233_v2  ;;  %v1165_v3 = vld [vmem:[%s1691_s1 + $0xe0] ss:$16 sps:$4 sm:$0xff]   ;;  %v1166_v4 = vld [vmem:[%s1691_s1 + $0xe8] ss:$16 sps:$4 sm:$0xff]   ;;  %v1167_v5 = vld [vmem:[%s1691_s1 + $0xc4] ss:$16 sps:$4 sm:$0xff]  }
   0xd   : > { %519 = vmatprep.subr.bf16.mxu0 %v1161_v0  ;;  %712 = vmatprep.subr.bf16.mxu1 %v1163_v1  ;;  %v1169_v6 = vld [vmem:[%s1691_s1 + $0xcc] ss:$16 sps:$4 sm:$0xff]   ;;  %v1171_v7 = vld [vmem:[%s1691_s1 + $0xc0] ss:$16 sps:$4 sm:$0xff]   ;;  %v1172_v8 = vld [vmem:[%s1691_s1 + $0xc8] ss:$16 sps:$4 sm:$0xff]  }
   0xe   : > { %520 = vmatpush1.bf16.msra.mxu0 %v1165_v3  ;;  %713 = vmatpush1.bf16.msra.mxu1 %v1166_v4  ;;  %v1173_v9 = vld [vmem:[%s1691_s1 + $0xa4] ss:$16 sps:$4 sm:$0xff]   ;;  %v1175_v10 = vld [vmem:[%s1691_s1 + $0xac] ss:$16 sps:$4 sm:$0xff]   ;;  %v1177_v11 = vld [vmem:[%s1691_s1 + $0xa0] ss:$16 sps:$4 sm:$0xff]  }
   0xf   : > { %521 = vmatprep.subr.bf16.mxu0 %v1167_v5  ;;  %714 = vmatprep.subr.bf16.mxu1 %v1169_v6  ;;  %v1178_v12 = vld [vmem:[%s1691_s1 + $0xa8] ss:$16 sps:$4 sm:$0xff]   ;;  %v1179_v13 = vld [vmem:[%s1691_s1 + $0x84] ss:$16 sps:$4 sm:$0xff]   ;;  %v1181_v14 = vld [vmem:[%s1691_s1 + $0x8c] ss:$16 sps:$4 sm:$0xff]  }
  0x10   : > { %v1183_v15 = vld [vmem:[%s1691_s1 + $0x80] ss:$16 sps:$4 sm:$0xff]   ;;  %v1184_v16 = vld [vmem:[%s1691_s1 + $0x88] ss:$16 sps:$4 sm:$0xff]   ;;  %v1185_v17 = vld [vmem:[%s1691_s1 + $0x64] ss:$16 sps:$4 sm:$0xff]  }
  0x11   : > { %v1187_v18 = vld [vmem:[%s1691_s1 + $0x6c] ss:$16 sps:$4 sm:$0xff]   ;;  %v1189_v19 = vld [vmem:[%s1691_s1 + $0x60] ss:$16 sps:$4 sm:$0xff]   ;;  %v1190_v20 = vld [vmem:[%s1691_s1 + $0x68] ss:$16 sps:$4 sm:$0xff]  }
  0x12   : > { %522 = vmatpush1.bf16.msra.mxu0 %v1171_v7  ;;  %715 = vmatpush1.bf16.msra.mxu1 %v1172_v8  ;;  %v1191_v21 = vld [vmem:[%s1691_s1 + $0x44] ss:$16 sps:$4 sm:$0xff]   ;;  %v1193_v22 = vld [vmem:[%s1691_s1 + $0x4c] ss:$16 sps:$4 sm:$0xff]   ;;  %s1097_s7 = sshll.u32 %s1695_s5, 2  ;;  %v244_v50 = vshrl.u32 %v243_v49, 7 }
  0x13   : > { %523 = vmatprep.subr.bf16.mxu0 %v1173_v9  ;;  %716 = vmatprep.subr.bf16.mxu1 %v1175_v10  ;;  %v1195_v23 = vld [vmem:[%s1691_s1 + $0x40] ss:$16 sps:$4 sm:$0xff]   ;;  %v1196_v24 = vld [vmem:[%s1691_s1 + $0x48] ss:$16 sps:$4 sm:$0xff]   ;;  %v1197_v25 = vld [vmem:[%s1691_s1 + $0x24] ss:$16 sps:$4 sm:$0xff]   ;;  %s1345_s17 = scalar_lea.vmem %s1690_s0, %s1097_s7 }
  0x14   : > { %v1199_v26 = vld [vmem:[%s1691_s1 + $0x2c] ss:$16 sps:$4 sm:$0xff]   ;;  %v1201_v27 = vld [vmem:[%s1691_s1 + $0x20] ss:$16 sps:$4 sm:$0xff]   ;;  %v1202_v28 = vld [vmem:[%s1691_s1 + $0x28] ss:$16 sps:$4 sm:$0xff]  }
  0x15   : > { %v1203_v29 = vld [vmem:[%s1691_s1 + $0x4] ss:$16 sps:$4 sm:$0xff]   ;;  %v1205_v30 = vld [vmem:[%s1691_s1 + $0xc] ss:$16 sps:$4 sm:$0xff]   ;;  %v1207_v31 = vld [vmem:[%s1691_s1] ss:$16 sps:$4 sm:$0xff]  }
  0x16   : > { %524 = vmatpush1.bf16.msra.mxu0 %v1177_v11  ;;  %717 = vmatpush1.bf16.msra.mxu1 %v1178_v12  ;;  %v1208_v32 = vld [vmem:[%s1691_s1 + $0x8] ss:$16 sps:$4 sm:$0xff]   ;;  %v1209_v33 = vld [vmem:[%s1345_s17] sm:$0xff]   ;;  %v1211_v35 = vld [vmem:[%s1345_s17 + $0x10] sm:$0xff]   ;;  %v245_v51 = vsub.s32 0, %v244_v50  ;;  %v253_v52 = vsub.s32 2, %v244_v50 }
  0x17   : > { %525 = vmatprep.subr.bf16.mxu0 %v1179_v13  ;;  %718 = vmatprep.subr.bf16.mxu1 %v1181_v14  ;;  %v1210_v34 = vld [vmem:[%s1345_s17 + $0x8] sm:$0xff]   ;;  %v1212_v36 = vld [vmem:[%s1345_s17 + $0x18] sm:$0xff]   ;;  %v1213_v37 = vld [vmem:[%s1345_s17 + $0x20] sm:$0xff]   ;;  %v249_v54 = vsub.s32 1, %v244_v50  ;;  %v257_v55 = vsub.s32 3, %v244_v50  ;;  %s1151_s8 = sshll.u32 %s1695_s5, 5 }
  0x18   : > { %v1214_v38 = vld [vmem:[%s1345_s17 + $0x28] sm:$0xff]   ;;  %v1215_v39 = vld [vmem:[%s1345_s17 + $0x30] sm:$0xff]   ;;  %v1216_v40 = vld [vmem:[%s1345_s17 + $0x38] sm:$0xff]   ;;  %s1429_s11 = scalar_lea.vmem %s1693_s3, %s1151_s8 }
  0x19   : > { %v1217_v41 = vld [vmem:[%s1345_s17 + $0x40] sm:$0xff]   ;;  %v1218_v42 = vld [vmem:[%s1345_s17 + $0x48] sm:$0xff]   ;;  %v1219_v43 = vld [vmem:[%s1345_s17 + $0x50] sm:$0xff]  }
  0x1a   : > { %526 = vmatpush1.bf16.msra.mxu0 %v1183_v15  ;;  %719 = vmatpush1.bf16.msra.mxu1 %v1184_v16  ;;  %v1220_v44 = vld [vmem:[%s1345_s17 + $0x58] sm:$0xff]   ;;  %v1221_v45 = vld [vmem:[%s1345_s17 + $0x60] sm:$0xff]   ;;  %v1222_v46 = vld [vmem:[%s1345_s17 + $0x68] sm:$0xff]  }
  0x1b   : > { %527 = vmatprep.subr.bf16.mxu0 %v1185_v17  ;;  %720 = vmatprep.subr.bf16.mxu1 %v1187_v18  ;;  %v1223_v47 = vld [vmem:[%s1345_s17 + $0x70] sm:$0xff]   ;;  %v1224_v48 = vld [vmem:[%s1345_s17 + $0x78] sm:$0xff]   ;;  %v241_v53 = vld [vmem:[%s1692_s2] sm:$0xf] }
  0x1c   : > { %v1418_v56 = vrot.slane %v241_v53, %v245_v51  ;;  %v1420_v57 = vrot.slane %v241_v53, %v253_v52  ;;  %v1422_v58 = vrot.slane %v241_v53, %v249_v54  ;;  %v1424_v59 = vrot.slane %v241_v53, %v257_v55 }
  0x1e   : > { %528 = vmatpush1.bf16.msra.mxu0 %v1189_v19  ;;  %721 = vmatpush1.bf16.msra.mxu1 %v1190_v20 }
  0x1f   : > { %529 = vmatprep.subr.bf16.mxu0 %v1191_v21  ;;  %722 = vmatprep.subr.bf16.mxu1 %v1193_v22 }
  0x22   : > { %530 = vmatpush1.bf16.msra.mxu0 %v1195_v23  ;;  %723 = vmatpush1.bf16.msra.mxu1 %v1196_v24 }
  0x23   : > { %531 = vmatprep.subr.bf16.mxu0 %v1197_v25  ;;  %724 = vmatprep.subr.bf16.mxu1 %v1199_v26 }
  0x26   : > { %532 = vmatpush1.bf16.msra.mxu0 %v1201_v27  ;;  %725 = vmatpush1.bf16.msra.mxu1 %v1202_v28 }
  0x27   : > { %533 = vmatprep.subr.bf16.mxu0 %v1203_v29  ;;  %726 = vmatprep.subr.bf16.mxu1 %v1205_v30 }
  0x2a   : > { %534 = vmatpush1.bf16.msra.mxu0 %v1207_v31  ;;  %727 = vmatpush1.bf16.msra.mxu1 %v1208_v32 }
  0x2d   : > { %552 = vmatmul.mubr.bf16.vlgmr.msra.gmra.mxu0 %v1209_v33  ;;  %745 = vmatmul.mubr.bf16.vlgmr.msra.gmra.mxu1 %v1209_v33 }
  0x2e   : > { %561 = vmatprep.mubr.bf16.mxu0 %v1233_v2  ;;  %754 = vmatprep.mubr.bf16.mxu1 %v1233_v2 }
  0x35   : > { %562 = vmatmul.mubr.bf16.gmra.mxu0 %v1210_v34  ;;  %755 = vmatmul.mubr.bf16.gmra.mxu1 %v1210_v34 }
  0x36   : > { %571 = vmatprep.mubr.bf16.mxu0 %v1233_v2  ;;  %764 = vmatprep.mubr.bf16.mxu1 %v1233_v2 }
  0x3d   : > { %572 = vmatmul.mubr.bf16.gmra.mxu0 %v1211_v35  ;;  %765 = vmatmul.mubr.bf16.gmra.mxu1 %v1211_v35 }
  0x3e   : > { %581 = vmatprep.mubr.bf16.mxu0 %v1233_v2  ;;  %774 = vmatprep.mubr.bf16.mxu1 %v1233_v2 }
  0x45   : > { %582 = vmatmul.mubr.bf16.gmra.mxu0 %v1212_v36  ;;  %775 = vmatmul.mubr.bf16.gmra.mxu1 %v1212_v36 }
  0x46   : > { %591 = vmatprep.mubr.bf16.mxu0 %v1233_v2  ;;  %784 = vmatprep.mubr.bf16.mxu1 %v1233_v2 }
  0x4d   : > { %592 = vmatmul.mubr.bf16.gmra.mxu0 %v1213_v37  ;;  %785 = vmatmul.mubr.bf16.gmra.mxu1 %v1213_v37 }
  0x4e   : > { %601 = vmatprep.mubr.bf16.mxu0 %v1233_v2  ;;  %794 = vmatprep.mubr.bf16.mxu1 %v1233_v2 }
  0x55   : > { %602 = vmatmul.mubr.bf16.gmra.mxu0 %v1214_v38  ;;  %795 = vmatmul.mubr.bf16.gmra.mxu1 %v1214_v38 }
  0x56   : > { %611 = vmatprep.mubr.bf16.mxu0 %v1233_v2  ;;  %804 = vmatprep.mubr.bf16.mxu1 %v1233_v2 }
  0x5d   : > { %612 = vmatmul.mubr.bf16.gmra.mxu0 %v1215_v39  ;;  %805 = vmatmul.mubr.bf16.gmra.mxu1 %v1215_v39 }
  0x5e   : > { %621 = vmatprep.mubr.bf16.mxu0 %v1233_v2  ;;  %814 = vmatprep.mubr.bf16.mxu1 %v1233_v2 }
  0x65   : > { %622 = vmatmul.mubr.bf16.gmra.mxu0 %v1216_v40  ;;  %815 = vmatmul.mubr.bf16.gmra.mxu1 %v1216_v40 }
  0x66   : > { %631 = vmatprep.mubr.bf16.mxu0 %v1233_v2  ;;  %824 = vmatprep.mubr.bf16.mxu1 %v1233_v2 }
  0x6d   : > { %632 = vmatmul.mubr.bf16.gmra.mxu0 %v1217_v41  ;;  %825 = vmatmul.mubr.bf16.gmra.mxu1 %v1217_v41 }
  0x6e   : > { %641 = vmatprep.mubr.bf16.mxu0 %v1233_v2  ;;  %834 = vmatprep.mubr.bf16.mxu1 %v1233_v2 }
  0x75   : > { %642 = vmatmul.mubr.bf16.gmra.mxu0 %v1218_v42  ;;  %835 = vmatmul.mubr.bf16.gmra.mxu1 %v1218_v42 }
  0x76   : > { %651 = vmatprep.mubr.bf16.mxu0 %v1233_v2  ;;  %844 = vmatprep.mubr.bf16.mxu1 %v1233_v2 }
  0x7d   : > { %652 = vmatmul.mubr.bf16.gmra.mxu0 %v1219_v43  ;;  %845 = vmatmul.mubr.bf16.gmra.mxu1 %v1219_v43 }
  0x7e   : > { %661 = vmatprep.mubr.bf16.mxu0 %v1233_v2  ;;  %854 = vmatprep.mubr.bf16.mxu1 %v1233_v2 }
  0x85   : > { %662 = vmatmul.mubr.bf16.gmra.mxu0 %v1220_v44  ;;  %855 = vmatmul.mubr.bf16.gmra.mxu1 %v1220_v44 }
  0x86   : > { %671 = vmatprep.mubr.bf16.mxu0 %v1233_v2  ;;  %864 = vmatprep.mubr.bf16.mxu1 %v1233_v2 }
  0x8d   : > { %672 = vmatmul.mubr.bf16.gmra.mxu0 %v1221_v45  ;;  %865 = vmatmul.mubr.bf16.gmra.mxu1 %v1221_v45 }
  0x8e   : > { %681 = vmatprep.mubr.bf16.mxu0 %v1233_v2  ;;  %874 = vmatprep.mubr.bf16.mxu1 %v1233_v2 }
  0x95   : > { %682 = vmatmul.mubr.bf16.gmra.mxu0 %v1222_v46  ;;  %875 = vmatmul.mubr.bf16.gmra.mxu1 %v1222_v46 }
  0x96   : > { %691 = vmatprep.mubr.bf16.mxu0 %v1233_v2  ;;  %884 = vmatprep.mubr.bf16.mxu1 %v1233_v2 }
  0x9d   : > { %692 = vmatmul.mubr.bf16.gmra.mxu0 %v1223_v47  ;;  %885 = vmatmul.mubr.bf16.gmra.mxu1 %v1223_v47 }
  0x9e   : > { %701 = vmatprep.mubr.bf16.mxu0 %v1233_v2  ;;  %894 = vmatprep.mubr.bf16.mxu1 %v1233_v2 }
  0xa5   : > { %702 = vmatmul.mubr.bf16.gmra.mxu0 %v1224_v48  ;;  %895 = vmatmul.mubr.bf16.gmra.mxu1 %v1224_v48 }
  0xed   : > { %v553_v60 = vpop.f32.mrf.mxu0  ;;  %v746_v61 = vpop.f32.mrf.mxu1 }
  0xee   : > { %v554_v62 = vadd.f32 %v553_v60, %v1418_v56  ;;  %v747_v63 = vadd.f32 %v746_v61, %v1420_v57 }
  0xef   : > { %v555_v0 = vpop.f32.mrf.mxu0  ;;  %v748_v1 = vpop.f32.mrf.mxu1 }
  0xf0   : > { %905 = vst [vmem:[%s1429_s11] sm:$0xff] %v554_v62  ;;  %907 = vst [vmem:[%s1429_s11 + $0x10] sm:$0xff] %v747_v63  ;;  %v556_v2 = vadd.f32 %v555_v0, %v1422_v58  ;;  %v749_v3 = vadd.f32 %v748_v1, %v1424_v59 }
  0xf1   : > { %v557_v4 = vpop.f32.mrf.mxu0  ;;  %v750_v5 = vpop.f32.mrf.mxu1 }
  0xf2   : > { %906 = vst [vmem:[%s1429_s11 + $0x8] sm:$0xff] %v556_v2  ;;  %908 = vst [vmem:[%s1429_s11 + $0x18] sm:$0xff] %v749_v3  ;;  %v558_v6 = vadd.f32 %v557_v4, %v1418_v56  ;;  %v751_v7 = vadd.f32 %v750_v5, %v1420_v57 }
  0xf3   : > { %v559_v8 = vpop.f32.mrf.mxu0  ;;  %v752_v9 = vpop.f32.mrf.mxu1 }
  0xf4   : > { %909 = vst [vmem:[%s1429_s11 + $0x20] sm:$0xff] %v558_v6  ;;  %911 = vst [vmem:[%s1429_s11 + $0x30] sm:$0xff] %v751_v7  ;;  %v560_v10 = vadd.f32 %v559_v8, %v1422_v58  ;;  %v753_v11 = vadd.f32 %v752_v9, %v1424_v59 }
  0xf5   : > { %v563_v12 = vpop.f32.mrf.mxu0  ;;  %v756_v13 = vpop.f32.mrf.mxu1 }
  0xf6   : > { %910 = vst [vmem:[%s1429_s11 + $0x28] sm:$0xff] %v560_v10  ;;  %912 = vst [vmem:[%s1429_s11 + $0x38] sm:$0xff] %v753_v11  ;;  %v564_v14 = vadd.f32 %v563_v12, %v1418_v56  ;;  %v757_v15 = vadd.f32 %v756_v13, %v1420_v57 }
  0xf7   : > { %v565_v16 = vpop.f32.mrf.mxu0  ;;  %v758_v17 = vpop.f32.mrf.mxu1 }
  0xf8   : > { %913 = vst [vmem:[%s1429_s11 + $0x40] sm:$0xff] %v564_v14  ;;  %915 = vst [vmem:[%s1429_s11 + $0x50] sm:$0xff] %v757_v15  ;;  %v566_v18 = vadd.f32 %v565_v16, %v1422_v58  ;;  %v759_v19 = vadd.f32 %v758_v17, %v1424_v59 }
  0xf9   : > { %v567_v20 = vpop.f32.mrf.mxu0  ;;  %v760_v21 = vpop.f32.mrf.mxu1 }
  0xfa   : > { %914 = vst [vmem:[%s1429_s11 + $0x48] sm:$0xff] %v566_v18  ;;  %916 = vst [vmem:[%s1429_s11 + $0x58] sm:$0xff] %v759_v19  ;;  %v568_v22 = vadd.f32 %v567_v20, %v1418_v56  ;;  %v761_v23 = vadd.f32 %v760_v21, %v1420_v57 }
  0xfb   : > { %v569_v24 = vpop.f32.mrf.mxu0  ;;  %v762_v25 = vpop.f32.mrf.mxu1 }
  0xfc   : > { %917 = vst [vmem:[%s1429_s11 + $0x60] sm:$0xff] %v568_v22  ;;  %919 = vst [vmem:[%s1429_s11 + $0x70] sm:$0xff] %v761_v23  ;;  %v570_v26 = vadd.f32 %v569_v24, %v1422_v58  ;;  %v763_v27 = vadd.f32 %v762_v25, %v1424_v59 }
  0xfd   : > { %v573_v28 = vpop.f32.mrf.mxu0  ;;  %v766_v29 = vpop.f32.mrf.mxu1 }
  0xfe   : > { %918 = vst [vmem:[%s1429_s11 + $0x68] sm:$0xff] %v570_v26  ;;  %920 = vst [vmem:[%s1429_s11 + $0x78] sm:$0xff] %v763_v27  ;;  %v574_v30 = vadd.f32 %v573_v28, %v1418_v56  ;;  %v767_v31 = vadd.f32 %v766_v29, %v1420_v57 }
  0xff   : > { %v575_v32 = vpop.f32.mrf.mxu0  ;;  %v768_v33 = vpop.f32.mrf.mxu1 }
 0x100   : > { %921 = vst [vmem:[%s1429_s11 + $0x80] sm:$0xff] %v574_v30  ;;  %923 = vst [vmem:[%s1429_s11 + $0x90] sm:$0xff] %v767_v31  ;;  %v576_v34 = vadd.f32 %v575_v32, %v1422_v58  ;;  %v769_v35 = vadd.f32 %v768_v33, %v1424_v59 }
 0x101   : > { %v577_v36 = vpop.f32.mrf.mxu0  ;;  %v770_v37 = vpop.f32.mrf.mxu1 }
 0x102   : > { %922 = vst [vmem:[%s1429_s11 + $0x88] sm:$0xff] %v576_v34  ;;  %924 = vst [vmem:[%s1429_s11 + $0x98] sm:$0xff] %v769_v35  ;;  %v578_v38 = vadd.f32 %v577_v36, %v1418_v56  ;;  %v771_v39 = vadd.f32 %v770_v37, %v1420_v57 }
 0x103   : > { %v579_v40 = vpop.f32.mrf.mxu0  ;;  %v772_v41 = vpop.f32.mrf.mxu1 }
 0x104   : > { %925 = vst [vmem:[%s1429_s11 + $0xa0] sm:$0xff] %v578_v38  ;;  %927 = vst [vmem:[%s1429_s11 + $0xb0] sm:$0xff] %v771_v39  ;;  %v580_v42 = vadd.f32 %v579_v40, %v1422_v58  ;;  %v773_v43 = vadd.f32 %v772_v41, %v1424_v59 }
 0x105   : > { %v583_v44 = vpop.f32.mrf.mxu0  ;;  %v776_v45 = vpop.f32.mrf.mxu1 }
 0x106   : > { %926 = vst [vmem:[%s1429_s11 + $0xa8] sm:$0xff] %v580_v42  ;;  %928 = vst [vmem:[%s1429_s11 + $0xb8] sm:$0xff] %v773_v43  ;;  %v584_v46 = vadd.f32 %v583_v44, %v1418_v56  ;;  %v777_v47 = vadd.f32 %v776_v45, %v1420_v57 }
 0x107   : > { %v585_v48 = vpop.f32.mrf.mxu0  ;;  %v778_v49 = vpop.f32.mrf.mxu1 }
 0x108   : > { %929 = vst [vmem:[%s1429_s11 + $0xc0] sm:$0xff] %v584_v46  ;;  %931 = vst [vmem:[%s1429_s11 + $0xd0] sm:$0xff] %v777_v47  ;;  %v586_v50 = vadd.f32 %v585_v48, %v1422_v58  ;;  %v779_v51 = vadd.f32 %v778_v49, %v1424_v59 }
 0x109   : > { %v587_v52 = vpop.f32.mrf.mxu0  ;;  %v780_v53 = vpop.f32.mrf.mxu1 }
 0x10a   : > { %930 = vst [vmem:[%s1429_s11 + $0xc8] sm:$0xff] %v586_v50  ;;  %932 = vst [vmem:[%s1429_s11 + $0xd8] sm:$0xff] %v779_v51  ;;  %v588_v54 = vadd.f32 %v587_v52, %v1418_v56  ;;  %v781_v55 = vadd.f32 %v780_v53, %v1420_v57 }
 0x10b   : > { %v589_v60 = vpop.f32.mrf.mxu0  ;;  %v782_v61 = vpop.f32.mrf.mxu1 }
 0x10c   : > { %933 = vst [vmem:[%s1429_s11 + $0xe0] sm:$0xff] %v588_v54  ;;  %935 = vst [vmem:[%s1429_s11 + $0xf0] sm:$0xff] %v781_v55  ;;  %v590_v62 = vadd.f32 %v589_v60, %v1422_v58  ;;  %v783_v63 = vadd.f32 %v782_v61, %v1424_v59 }
 0x10d   : > { %v593_v0 = vpop.f32.mrf.mxu0  ;;  %v786_v1 = vpop.f32.mrf.mxu1 }
 0x10e   : > { %934 = vst [vmem:[%s1429_s11 + $0xe8] sm:$0xff] %v590_v62  ;;  %936 = vst [vmem:[%s1429_s11 + $0xf8] sm:$0xff] %v783_v63  ;;  %v594_v2 = vadd.f32 %v593_v0, %v1418_v56  ;;  %v787_v3 = vadd.f32 %v786_v1, %v1420_v57 }
 0x10f   : > { %v595_v4 = vpop.f32.mrf.mxu0  ;;  %v788_v5 = vpop.f32.mrf.mxu1 }
 0x110   : > { %937 = vst [vmem:[%s1429_s11 + $0x100] sm:$0xff] %v594_v2  ;;  %939 = vst [vmem:[%s1429_s11 + $0x110] sm:$0xff] %v787_v3  ;;  %v596_v6 = vadd.f32 %v595_v4, %v1422_v58  ;;  %v789_v7 = vadd.f32 %v788_v5, %v1424_v59 }
 0x111   : > { %v597_v8 = vpop.f32.mrf.mxu0  ;;  %v790_v9 = vpop.f32.mrf.mxu1 }
 0x112   : > { %938 = vst [vmem:[%s1429_s11 + $0x108] sm:$0xff] %v596_v6  ;;  %940 = vst [vmem:[%s1429_s11 + $0x118] sm:$0xff] %v789_v7  ;;  %v598_v10 = vadd.f32 %v597_v8, %v1418_v56  ;;  %v791_v11 = vadd.f32 %v790_v9, %v1420_v57 }
 0x113   : > { %v599_v12 = vpop.f32.mrf.mxu0  ;;  %v792_v13 = vpop.f32.mrf.mxu1 }
 0x114   : > { %941 = vst [vmem:[%s1429_s11 + $0x120] sm:$0xff] %v598_v10  ;;  %943 = vst [vmem:[%s1429_s11 + $0x130] sm:$0xff] %v791_v11  ;;  %v600_v14 = vadd.f32 %v599_v12, %v1422_v58  ;;  %v793_v15 = vadd.f32 %v792_v13, %v1424_v59 }
 0x115   : > { %v603_v16 = vpop.f32.mrf.mxu0  ;;  %v796_v17 = vpop.f32.mrf.mxu1 }
 0x116   : > { %942 = vst [vmem:[%s1429_s11 + $0x128] sm:$0xff] %v600_v14  ;;  %944 = vst [vmem:[%s1429_s11 + $0x138] sm:$0xff] %v793_v15  ;;  %v604_v18 = vadd.f32 %v603_v16, %v1418_v56  ;;  %v797_v19 = vadd.f32 %v796_v17, %v1420_v57 }
 0x117   : > { %v605_v20 = vpop.f32.mrf.mxu0  ;;  %v798_v21 = vpop.f32.mrf.mxu1 }
 0x118   : > { %945 = vst [vmem:[%s1429_s11 + $0x140] sm:$0xff] %v604_v18  ;;  %947 = vst [vmem:[%s1429_s11 + $0x150] sm:$0xff] %v797_v19  ;;  %v606_v22 = vadd.f32 %v605_v20, %v1422_v58  ;;  %v799_v23 = vadd.f32 %v798_v21, %v1424_v59 }
 0x119   : > { %v607_v24 = vpop.f32.mrf.mxu0  ;;  %v800_v25 = vpop.f32.mrf.mxu1 }
 0x11a   : > { %946 = vst [vmem:[%s1429_s11 + $0x148] sm:$0xff] %v606_v22  ;;  %948 = vst [vmem:[%s1429_s11 + $0x158] sm:$0xff] %v799_v23  ;;  %v608_v26 = vadd.f32 %v607_v24, %v1418_v56  ;;  %v801_v27 = vadd.f32 %v800_v25, %v1420_v57 }
 0x11b   : > { %v609_v28 = vpop.f32.mrf.mxu0  ;;  %v802_v29 = vpop.f32.mrf.mxu1 }
 0x11c   : > { %949 = vst [vmem:[%s1429_s11 + $0x160] sm:$0xff] %v608_v26  ;;  %951 = vst [vmem:[%s1429_s11 + $0x170] sm:$0xff] %v801_v27  ;;  %v610_v30 = vadd.f32 %v609_v28, %v1422_v58  ;;  %v803_v31 = vadd.f32 %v802_v29, %v1424_v59 }
 0x11d   : > { %v613_v32 = vpop.f32.mrf.mxu0  ;;  %v806_v33 = vpop.f32.mrf.mxu1 }
 0x11e   : > { %950 = vst [vmem:[%s1429_s11 + $0x168] sm:$0xff] %v610_v30  ;;  %952 = vst [vmem:[%s1429_s11 + $0x178] sm:$0xff] %v803_v31  ;;  %v614_v34 = vadd.f32 %v613_v32, %v1418_v56  ;;  %v807_v35 = vadd.f32 %v806_v33, %v1420_v57 }
 0x11f   : > { %v615_v36 = vpop.f32.mrf.mxu0  ;;  %v808_v37 = vpop.f32.mrf.mxu1 }
 0x120   : > { %953 = vst [vmem:[%s1429_s11 + $0x180] sm:$0xff] %v614_v34  ;;  %955 = vst [vmem:[%s1429_s11 + $0x190] sm:$0xff] %v807_v35  ;;  %v616_v38 = vadd.f32 %v615_v36, %v1422_v58  ;;  %v809_v39 = vadd.f32 %v808_v37, %v1424_v59 }
 0x121   : > { %v617_v40 = vpop.f32.mrf.mxu0  ;;  %v810_v41 = vpop.f32.mrf.mxu1 }
 0x122   : > { %954 = vst [vmem:[%s1429_s11 + $0x188] sm:$0xff] %v616_v38  ;;  %956 = vst [vmem:[%s1429_s11 + $0x198] sm:$0xff] %v809_v39  ;;  %v618_v42 = vadd.f32 %v617_v40, %v1418_v56  ;;  %v811_v43 = vadd.f32 %v810_v41, %v1420_v57 }
 0x123   : > { %v619_v44 = vpop.f32.mrf.mxu0  ;;  %v812_v45 = vpop.f32.mrf.mxu1 }
 0x124   : > { %957 = vst [vmem:[%s1429_s11 + $0x1a0] sm:$0xff] %v618_v42  ;;  %959 = vst [vmem:[%s1429_s11 + $0x1b0] sm:$0xff] %v811_v43  ;;  %v620_v46 = vadd.f32 %v619_v44, %v1422_v58  ;;  %v813_v47 = vadd.f32 %v812_v45, %v1424_v59 }
 0x125   : > { %v623_v48 = vpop.f32.mrf.mxu0  ;;  %v816_v49 = vpop.f32.mrf.mxu1 }
 0x126   : > { %958 = vst [vmem:[%s1429_s11 + $0x1a8] sm:$0xff] %v620_v46  ;;  %960 = vst [vmem:[%s1429_s11 + $0x1b8] sm:$0xff] %v813_v47  ;;  %v624_v50 = vadd.f32 %v623_v48, %v1418_v56  ;;  %v817_v51 = vadd.f32 %v816_v49, %v1420_v57 }
 0x127   : > { %v625_v52 = vpop.f32.mrf.mxu0  ;;  %v818_v53 = vpop.f32.mrf.mxu1 }
 0x128   : > { %961 = vst [vmem:[%s1429_s11 + $0x1c0] sm:$0xff] %v624_v50  ;;  %963 = vst [vmem:[%s1429_s11 + $0x1d0] sm:$0xff] %v817_v51  ;;  %v626_v54 = vadd.f32 %v625_v52, %v1422_v58  ;;  %v819_v55 = vadd.f32 %v818_v53, %v1424_v59 }
 0x129   : > { %v627_v60 = vpop.f32.mrf.mxu0  ;;  %v820_v61 = vpop.f32.mrf.mxu1 }
 0x12a   : > { %962 = vst [vmem:[%s1429_s11 + $0x1c8] sm:$0xff] %v626_v54  ;;  %964 = vst [vmem:[%s1429_s11 + $0x1d8] sm:$0xff] %v819_v55  ;;  %v628_v62 = vadd.f32 %v627_v60, %v1418_v56  ;;  %v821_v63 = vadd.f32 %v820_v61, %v1420_v57 }
 0x12b   : > { %v629_v0 = vpop.f32.mrf.mxu0  ;;  %v822_v1 = vpop.f32.mrf.mxu1 }
 0x12c   : > { %965 = vst [vmem:[%s1429_s11 + $0x1e0] sm:$0xff] %v628_v62  ;;  %967 = vst [vmem:[%s1429_s11 + $0x1f0] sm:$0xff] %v821_v63  ;;  %v630_v2 = vadd.f32 %v629_v0, %v1422_v58  ;;  %v823_v3 = vadd.f32 %v822_v1, %v1424_v59 }
 0x12d   : > { %v633_v4 = vpop.f32.mrf.mxu0  ;;  %v826_v5 = vpop.f32.mrf.mxu1 }
 0x12e   : > { %966 = vst [vmem:[%s1429_s11 + $0x1e8] sm:$0xff] %v630_v2  ;;  %968 = vst [vmem:[%s1429_s11 + $0x1f8] sm:$0xff] %v823_v3  ;;  %v634_v6 = vadd.f32 %v633_v4, %v1418_v56  ;;  %v827_v7 = vadd.f32 %v826_v5, %v1420_v57 }
 0x12f   : > { %v635_v8 = vpop.f32.mrf.mxu0  ;;  %v828_v9 = vpop.f32.mrf.mxu1 }
 0x130   : > { %969 = vst [vmem:[%s1429_s11 + $0x200] sm:$0xff] %v634_v6  ;;  %971 = vst [vmem:[%s1429_s11 + $0x210] sm:$0xff] %v827_v7  ;;  %v636_v10 = vadd.f32 %v635_v8, %v1422_v58  ;;  %v829_v11 = vadd.f32 %v828_v9, %v1424_v59 }
 0x131   : > { %v637_v12 = vpop.f32.mrf.mxu0  ;;  %v830_v13 = vpop.f32.mrf.mxu1 }
 0x132   : > { %970 = vst [vmem:[%s1429_s11 + $0x208] sm:$0xff] %v636_v10  ;;  %972 = vst [vmem:[%s1429_s11 + $0x218] sm:$0xff] %v829_v11  ;;  %v638_v14 = vadd.f32 %v637_v12, %v1418_v56  ;;  %v831_v15 = vadd.f32 %v830_v13, %v1420_v57 }
 0x133   : > { %v639_v16 = vpop.f32.mrf.mxu0  ;;  %v832_v17 = vpop.f32.mrf.mxu1 }
 0x134   : > { %973 = vst [vmem:[%s1429_s11 + $0x220] sm:$0xff] %v638_v14  ;;  %975 = vst [vmem:[%s1429_s11 + $0x230] sm:$0xff] %v831_v15  ;;  %v640_v18 = vadd.f32 %v639_v16, %v1422_v58  ;;  %v833_v19 = vadd.f32 %v832_v17, %v1424_v59 }
 0x135   : > { %v643_v20 = vpop.f32.mrf.mxu0  ;;  %v836_v21 = vpop.f32.mrf.mxu1 }
 0x136   : > { %974 = vst [vmem:[%s1429_s11 + $0x228] sm:$0xff] %v640_v18  ;;  %976 = vst [vmem:[%s1429_s11 + $0x238] sm:$0xff] %v833_v19  ;;  %v644_v22 = vadd.f32 %v643_v20, %v1418_v56  ;;  %v837_v23 = vadd.f32 %v836_v21, %v1420_v57 }
 0x137   : > { %v645_v24 = vpop.f32.mrf.mxu0  ;;  %v838_v25 = vpop.f32.mrf.mxu1 }
 0x138   : > { %977 = vst [vmem:[%s1429_s11 + $0x240] sm:$0xff] %v644_v22  ;;  %979 = vst [vmem:[%s1429_s11 + $0x250] sm:$0xff] %v837_v23  ;;  %v646_v26 = vadd.f32 %v645_v24, %v1422_v58  ;;  %v839_v27 = vadd.f32 %v838_v25, %v1424_v59 }
 0x139   : > { %v647_v28 = vpop.f32.mrf.mxu0  ;;  %v840_v29 = vpop.f32.mrf.mxu1 }
 0x13a   : > { %978 = vst [vmem:[%s1429_s11 + $0x248] sm:$0xff] %v646_v26  ;;  %980 = vst [vmem:[%s1429_s11 + $0x258] sm:$0xff] %v839_v27  ;;  %v648_v30 = vadd.f32 %v647_v28, %v1418_v56  ;;  %v841_v31 = vadd.f32 %v840_v29, %v1420_v57 }
 0x13b   : > { %v649_v32 = vpop.f32.mrf.mxu0  ;;  %v842_v33 = vpop.f32.mrf.mxu1 }
 0x13c   : > { %981 = vst [vmem:[%s1429_s11 + $0x260] sm:$0xff] %v648_v30  ;;  %983 = vst [vmem:[%s1429_s11 + $0x270] sm:$0xff] %v841_v31  ;;  %v650_v34 = vadd.f32 %v649_v32, %v1422_v58  ;;  %v843_v35 = vadd.f32 %v842_v33, %v1424_v59 }
 0x13d   : > { %v653_v36 = vpop.f32.mrf.mxu0  ;;  %v846_v37 = vpop.f32.mrf.mxu1 }
 0x13e   : > { %982 = vst [vmem:[%s1429_s11 + $0x268] sm:$0xff] %v650_v34  ;;  %984 = vst [vmem:[%s1429_s11 + $0x278] sm:$0xff] %v843_v35  ;;  %v654_v38 = vadd.f32 %v653_v36, %v1418_v56  ;;  %v847_v39 = vadd.f32 %v846_v37, %v1420_v57 }
 0x13f   : > { %v655_v40 = vpop.f32.mrf.mxu0  ;;  %v848_v41 = vpop.f32.mrf.mxu1 }
 0x140   : > { %985 = vst [vmem:[%s1429_s11 + $0x280] sm:$0xff] %v654_v38  ;;  %987 = vst [vmem:[%s1429_s11 + $0x290] sm:$0xff] %v847_v39  ;;  %v656_v42 = vadd.f32 %v655_v40, %v1422_v58  ;;  %v849_v43 = vadd.f32 %v848_v41, %v1424_v59 }
 0x141   : > { %v657_v44 = vpop.f32.mrf.mxu0  ;;  %v850_v45 = vpop.f32.mrf.mxu1 }
 0x142   : > { %986 = vst [vmem:[%s1429_s11 + $0x288] sm:$0xff] %v656_v42  ;;  %988 = vst [vmem:[%s1429_s11 + $0x298] sm:$0xff] %v849_v43  ;;  %v658_v46 = vadd.f32 %v657_v44, %v1418_v56  ;;  %v851_v47 = vadd.f32 %v850_v45, %v1420_v57 }
 0x143   : > { %v659_v48 = vpop.f32.mrf.mxu0  ;;  %v852_v49 = vpop.f32.mrf.mxu1 }
 0x144   : > { %989 = vst [vmem:[%s1429_s11 + $0x2a0] sm:$0xff] %v658_v46  ;;  %991 = vst [vmem:[%s1429_s11 + $0x2b0] sm:$0xff] %v851_v47  ;;  %v660_v50 = vadd.f32 %v659_v48, %v1422_v58  ;;  %v853_v51 = vadd.f32 %v852_v49, %v1424_v59 }
 0x145   : > { %v663_v52 = vpop.f32.mrf.mxu0  ;;  %v856_v53 = vpop.f32.mrf.mxu1 }
 0x146   : > { %990 = vst [vmem:[%s1429_s11 + $0x2a8] sm:$0xff] %v660_v50  ;;  %992 = vst [vmem:[%s1429_s11 + $0x2b8] sm:$0xff] %v853_v51  ;;  %v664_v54 = vadd.f32 %v663_v52, %v1418_v56  ;;  %v857_v55 = vadd.f32 %v856_v53, %v1420_v57 }
 0x147   : > { %v665_v60 = vpop.f32.mrf.mxu0  ;;  %v858_v61 = vpop.f32.mrf.mxu1 }
 0x148   : > { %993 = vst [vmem:[%s1429_s11 + $0x2c0] sm:$0xff] %v664_v54  ;;  %995 = vst [vmem:[%s1429_s11 + $0x2d0] sm:$0xff] %v857_v55  ;;  %v666_v62 = vadd.f32 %v665_v60, %v1422_v58  ;;  %v859_v63 = vadd.f32 %v858_v61, %v1424_v59 }
 0x149   : > { %v667_v0 = vpop.f32.mrf.mxu0  ;;  %v860_v1 = vpop.f32.mrf.mxu1 }
 0x14a   : > { %994 = vst [vmem:[%s1429_s11 + $0x2c8] sm:$0xff] %v666_v62  ;;  %996 = vst [vmem:[%s1429_s11 + $0x2d8] sm:$0xff] %v859_v63  ;;  %v668_v2 = vadd.f32 %v667_v0, %v1418_v56  ;;  %v861_v3 = vadd.f32 %v860_v1, %v1420_v57 }
 0x14b   : > { %v669_v4 = vpop.f32.mrf.mxu0  ;;  %v862_v5 = vpop.f32.mrf.mxu1 }
 0x14c   : > { %997 = vst [vmem:[%s1429_s11 + $0x2e0] sm:$0xff] %v668_v2  ;;  %999 = vst [vmem:[%s1429_s11 + $0x2f0] sm:$0xff] %v861_v3  ;;  %v670_v6 = vadd.f32 %v669_v4, %v1422_v58  ;;  %v863_v7 = vadd.f32 %v862_v5, %v1424_v59 }
 0x14d   : > { %v673_v8 = vpop.f32.mrf.mxu0  ;;  %v866_v9 = vpop.f32.mrf.mxu1 }
 0x14e   : > { %998 = vst [vmem:[%s1429_s11 + $0x2e8] sm:$0xff] %v670_v6  ;;  %1000 = vst [vmem:[%s1429_s11 + $0x2f8] sm:$0xff] %v863_v7  ;;  %v674_v10 = vadd.f32 %v673_v8, %v1418_v56  ;;  %v867_v11 = vadd.f32 %v866_v9, %v1420_v57 }
 0x14f   : > { %v675_v12 = vpop.f32.mrf.mxu0  ;;  %v868_v13 = vpop.f32.mrf.mxu1 }
 0x150   : > { %1001 = vst [vmem:[%s1429_s11 + $0x300] sm:$0xff] %v674_v10  ;;  %1003 = vst [vmem:[%s1429_s11 + $0x310] sm:$0xff] %v867_v11  ;;  %v676_v14 = vadd.f32 %v675_v12, %v1422_v58  ;;  %v869_v15 = vadd.f32 %v868_v13, %v1424_v59 }
 0x151   : > { %v677_v16 = vpop.f32.mrf.mxu0  ;;  %v870_v17 = vpop.f32.mrf.mxu1 }
 0x152   : > { %1002 = vst [vmem:[%s1429_s11 + $0x308] sm:$0xff] %v676_v14  ;;  %1004 = vst [vmem:[%s1429_s11 + $0x318] sm:$0xff] %v869_v15  ;;  %v678_v18 = vadd.f32 %v677_v16, %v1418_v56  ;;  %v871_v19 = vadd.f32 %v870_v17, %v1420_v57 }
 0x153   : > { %v679_v20 = vpop.f32.mrf.mxu0  ;;  %v872_v21 = vpop.f32.mrf.mxu1 }
 0x154   : > { %1005 = vst [vmem:[%s1429_s11 + $0x320] sm:$0xff] %v678_v18  ;;  %1007 = vst [vmem:[%s1429_s11 + $0x330] sm:$0xff] %v871_v19  ;;  %v680_v22 = vadd.f32 %v679_v20, %v1422_v58  ;;  %v873_v23 = vadd.f32 %v872_v21, %v1424_v59 }
 0x155   : > { %v683_v24 = vpop.f32.mrf.mxu0  ;;  %v876_v25 = vpop.f32.mrf.mxu1 }
 0x156   : > { %1006 = vst [vmem:[%s1429_s11 + $0x328] sm:$0xff] %v680_v22  ;;  %1008 = vst [vmem:[%s1429_s11 + $0x338] sm:$0xff] %v873_v23  ;;  %v684_v26 = vadd.f32 %v683_v24, %v1418_v56  ;;  %v877_v27 = vadd.f32 %v876_v25, %v1420_v57 }
 0x157   : > { %v685_v28 = vpop.f32.mrf.mxu0  ;;  %v878_v29 = vpop.f32.mrf.mxu1 }
 0x158   : > { %1009 = vst [vmem:[%s1429_s11 + $0x340] sm:$0xff] %v684_v26  ;;  %1011 = vst [vmem:[%s1429_s11 + $0x350] sm:$0xff] %v877_v27  ;;  %v686_v30 = vadd.f32 %v685_v28, %v1422_v58  ;;  %v879_v31 = vadd.f32 %v878_v29, %v1424_v59 }
 0x159   : > { %v687_v32 = vpop.f32.mrf.mxu0  ;;  %v880_v33 = vpop.f32.mrf.mxu1 }
 0x15a   : > { %1010 = vst [vmem:[%s1429_s11 + $0x348] sm:$0xff] %v686_v30  ;;  %1012 = vst [vmem:[%s1429_s11 + $0x358] sm:$0xff] %v879_v31  ;;  %v688_v34 = vadd.f32 %v687_v32, %v1418_v56  ;;  %v881_v35 = vadd.f32 %v880_v33, %v1420_v57 }
 0x15b   : > { %v689_v36 = vpop.f32.mrf.mxu0  ;;  %v882_v37 = vpop.f32.mrf.mxu1 }
 0x15c   : > { %1013 = vst [vmem:[%s1429_s11 + $0x360] sm:$0xff] %v688_v34  ;;  %1015 = vst [vmem:[%s1429_s11 + $0x370] sm:$0xff] %v881_v35  ;;  %v690_v38 = vadd.f32 %v689_v36, %v1422_v58  ;;  %v883_v39 = vadd.f32 %v882_v37, %v1424_v59 }
 0x15d   : > { %v693_v40 = vpop.f32.mrf.mxu0  ;;  %v886_v41 = vpop.f32.mrf.mxu1 }
 0x15e   : > { %1014 = vst [vmem:[%s1429_s11 + $0x368] sm:$0xff] %v690_v38  ;;  %1016 = vst [vmem:[%s1429_s11 + $0x378] sm:$0xff] %v883_v39  ;;  %v694_v42 = vadd.f32 %v693_v40, %v1418_v56  ;;  %v887_v43 = vadd.f32 %v886_v41, %v1420_v57 }
 0x15f   : > { %v695_v44 = vpop.f32.mrf.mxu0  ;;  %v888_v45 = vpop.f32.mrf.mxu1 }
 0x160   : > { %1017 = vst [vmem:[%s1429_s11 + $0x380] sm:$0xff] %v694_v42  ;;  %1019 = vst [vmem:[%s1429_s11 + $0x390] sm:$0xff] %v887_v43  ;;  %v696_v46 = vadd.f32 %v695_v44, %v1422_v58  ;;  %v889_v47 = vadd.f32 %v888_v45, %v1424_v59 }
 0x161   : > { %v697_v48 = vpop.f32.mrf.mxu0  ;;  %v890_v49 = vpop.f32.mrf.mxu1 }
 0x162   : > { %1018 = vst [vmem:[%s1429_s11 + $0x388] sm:$0xff] %v696_v46  ;;  %1020 = vst [vmem:[%s1429_s11 + $0x398] sm:$0xff] %v889_v47  ;;  %v698_v50 = vadd.f32 %v697_v48, %v1418_v56  ;;  %v891_v51 = vadd.f32 %v890_v49, %v1420_v57 }
 0x163   : > { %v699_v52 = vpop.f32.mrf.mxu0  ;;  %v892_v53 = vpop.f32.mrf.mxu1 }
 0x164   : > { %1021 = vst [vmem:[%s1429_s11 + $0x3a0] sm:$0xff] %v698_v50  ;;  %1023 = vst [vmem:[%s1429_s11 + $0x3b0] sm:$0xff] %v891_v51  ;;  %v700_v54 = vadd.f32 %v699_v52, %v1422_v58  ;;  %v893_v55 = vadd.f32 %v892_v53, %v1424_v59 }
 0x165   : > { %v703_v60 = vpop.f32.mrf.mxu0  ;;  %v896_v61 = vpop.f32.mrf.mxu1 }
 0x166   : > { %1022 = vst [vmem:[%s1429_s11 + $0x3a8] sm:$0xff] %v700_v54  ;;  %1024 = vst [vmem:[%s1429_s11 + $0x3b8] sm:$0xff] %v893_v55  ;;  %v704_v62 = vadd.f32 %v703_v60, %v1418_v56  ;;  %v897_v63 = vadd.f32 %v896_v61, %v1420_v57 }
 0x167   : > { %v705_v0 = vpop.f32.mrf.mxu0  ;;  %v898_v1 = vpop.f32.mrf.mxu1 }
 0x168   : > { %1025 = vst [vmem:[%s1429_s11 + $0x3c0] sm:$0xff] %v704_v62  ;;  %1027 = vst [vmem:[%s1429_s11 + $0x3d0] sm:$0xff] %v897_v63  ;;  %v706_v2 = vadd.f32 %v705_v0, %v1422_v58  ;;  %v899_v3 = vadd.f32 %v898_v1, %v1424_v59 }
 0x169   : > { %v707_v4 = vpop.f32.mrf.mxu0  ;;  %v900_v5 = vpop.f32.mrf.mxu1 }
 0x16a   : > { %1026 = vst [vmem:[%s1429_s11 + $0x3c8] sm:$0xff] %v706_v2  ;;  %1028 = vst [vmem:[%s1429_s11 + $0x3d8] sm:$0xff] %v899_v3  ;;  %v708_v6 = vadd.f32 %v707_v4, %v1418_v56  ;;  %v901_v7 = vadd.f32 %v900_v5, %v1420_v57 }
 0x16b   : > { %v709_v8 = vpop.f32.mrf.mxu0  ;;  %v902_v9 = vpop.f32.mrf.mxu1 }
 0x16c   : > { %1029 = vst [vmem:[%s1429_s11 + $0x3e0] sm:$0xff] %v708_v6  ;;  %1031 = vst [vmem:[%s1429_s11 + $0x3f0] sm:$0xff] %v901_v7  ;;  %v710_v10 = vadd.f32 %v709_v8, %v1422_v58  ;;  %v903_v11 = vadd.f32 %v902_v9, %v1424_v59 }
 0x16e   : > { %1030 = vst [vmem:[%s1429_s11 + $0x3e8] sm:$0xff] %v710_v10  ;;  %1032 = vst [vmem:[%s1429_s11 + $0x3f8] sm:$0xff] %v903_v11 }
 0x16f PF: > { %s13_s12 = sadd.s32 1, %s1231_s12  }
 0x170   : > { %p10_p4 = scmp.ge.s32.totalorder %s13_s12, 4  }
 0x172   :  { %12 = sbr.rel (!%p10_p4) target bundleno = 1 (0x1), region = 62 }

</bundles_post_ra>
